<compile_context>
chip_gen: v7x
topology: tpu7x:2x2x1
jax: 0.10.0
libtpu: 0.0.40
codegen_flags: <defaults>
</compile_context>

<pallas_src>
import functools
import math

import jax
import jax.numpy as jnp
from jax.experimental import pallas as pl
from jax.experimental.pallas import tpu as pltpu


NC_PAD = 128  # lane-dense classifier output width (sliced to num_classes in the wrapper)


# ----------------------------- in-kernel helpers -----------------------------

def _mxu(a, w_bf16):
    # bf16 MXU operands (weights already stored bf16), f32 accumulation.
    return jnp.dot(a.astype(jnp.bfloat16), w_bf16,
                   preferred_element_type=jnp.float32)


def _layernorm(x, gamma, beta):
    mean = jnp.mean(x, axis=-1, keepdims=True)
    var = jnp.mean(jnp.square(x - mean), axis=-1, keepdims=True)
    return (x - mean) * jax.lax.rsqrt(var + 1e-12) * gamma + beta


# ----------------------------- fused stack kernel -----------------------------

def _bert_stack_kernel(emb_ref, negmask_ref, eg_ref, eb_ref,
                       wqkv_ref, bqkv_ref, wo_ref, bo_ref, g1_ref, be1_ref,
                       w1_ref, b1_ref, w2_ref, b2_ref, g2_ref, be2_ref,
                       fcw_ref, fcb_ref, outw_ref, outb_ref,
                       o_emb_ref, o_layers_ref, o_logits_ref,
                       x_scratch, *, num_heads, seq_len, scale):
    """One grid step = one transformer layer on one folded batch block."""
    l = pl.program_id(1)

    # ---- fused embedding LayerNorm (layer 0 prologue) ----
    @pl.when(l == 0)
    def _():
        x0 = _layernorm(emb_ref[...], eg_ref[...], eb_ref[...])
        x_scratch[...] = x0
        o_emb_ref[0] = x0                       # hidden_states[0]

    x = x_scratch[...]                          # (R, H) f32, R = batch_block * S
    R, H = x.shape
    dh = H // num_heads

    # ---- packed QKV projection: one bf16 MXU matmul over all batch rows ----
    qkv = _mxu(x, wqkv_ref[0]) + bqkv_ref[0]    # (R, 3H)

    # additive mask: -1e9 where key is padded OR key belongs to another batch
    neg = negmask_ref[0]                        # (R, R)

    # ---- attention: static per-head loop, all batches at once (block-diag mask)
    ctx_heads = []
    for h in range(num_heads):
        lo = h * dh
        qh = qkv[:, lo:lo + dh]                 # (R, dh)
        kh = qkv[:, H + lo:H + lo + dh]
        vh = qkv[:, 2 * H + lo:2 * H + lo + dh]
        s = jnp.dot(qh, kh.T, preferred_element_type=jnp.float32) * scale + neg
        s = s - jnp.max(s, axis=-1, keepdims=True)
        p = jnp.exp(s)
        p = p * pl.reciprocal(jnp.sum(p, axis=-1, keepdims=True), approx=True)
        ctx_heads.append(jnp.dot(p, vh, preferred_element_type=jnp.float32))
    ctx = jnp.concatenate(ctx_heads, axis=-1)   # (R, H)
    attn = _mxu(ctx, wo_ref[0]) + bo_ref[0]     # ONE output projection matmul

    # ---- add & norm 1 ----
    h1 = _layernorm(attn + x, g1_ref[0], be1_ref[0])

    # ---- feed-forward (GELU) + add & norm 2 ----
    # TODO(synk): HF BERT default is exact (erf) GELU; tanh approximation is used
    # here for robust Mosaic lowering (small numeric deviation).
    ff = jax.nn.gelu(_mxu(h1, w1_ref[0]) + b1_ref[0], approximate=True)
    x_new = _layernorm(_mxu(ff, w2_ref[0]) + b2_ref[0] + h1, g2_ref[0], be2_ref[0])

    x_scratch[...] = x_new                      # carry to next layer (VMEM resident)
    o_layers_ref[0, 0] = x_new                  # hidden_states[l + 1]

    # ---- fused classifier head on CLS rows (last layer only) ----
    @pl.when(l == pl.num_programs(1) - 1)
    def _():
        cls = jnp.concatenate(
            [x_new[b * seq_len:b * seq_len + 1, :] for b in range(R // seq_len)],
            axis=0)                             # (batch_block, H)
        embd = _mxu(cls, fcw_ref[...]) + fcb_ref[...]
        o_logits_ref[...] = _mxu(embd, outw_ref[...]) + outb_ref[...]


# ----------------------------- wrapper -----------------------------

def bert_stack(emb, attention_mask, params, cfg):
    B, S, H = emb.shape
    L = cfg["num_layers"]
    I = cfg["intermediate"]
    D1 = cfg["hidden_dim_1"]
    nh = cfg["num_heads"]

    # Fold the whole (tiny) batch into the matmul row dimension. For large B on
    # v7x, set BB < B so the leading "parallel" grid axis shards batch blocks
    # across both TensorCores.
    BB = B
    nb = B // BB
    R = BB * S

    emb_flat = emb.reshape(B * S, H)

    # Additive attention mask built once outside the kernel (tiny, DMA'd once per
    # batch block since its block index is constant along the layer axis):
    # 0 where (same batch AND key not padded), else -1e9.
    keep = attention_mask.astype(jnp.float32).reshape(nb, R)          # (nb, R)
    row_batch = jnp.arange(R) // S
    same_batch = (row_batch[:, None] == row_batch[None, :]).astype(jnp.float32)
    allow = same_batch[None, :, :] * keep[:, None, :]                 # (nb, R, R)
    neg_mask = (1.0 - allow) * (-1e9)

    kern = functools.partial(_bert_stack_kernel, num_heads=nh, seq_len=S,
                             scale=1.0 / math.sqrt(H // nh))

    def wspec(shape):      # per-layer stacked weights: block index = layer
        return pl.BlockSpec(shape, lambda bb, l: (l,) + (0,) * (len(shape) - 1))

    def cspec(shape):      # layer-invariant params: resident, DMA'd once
        return pl.BlockSpec(shape, lambda bb, l: (0,) * len(shape))

    o_emb, o_layers, logits_pad = pl.pallas_call(
        kern,
        out_shape=(
            jax.ShapeDtypeStruct((nb, R, H), jnp.float32),      # embedding-LN output
            jax.ShapeDtypeStruct((L, nb, R, H), jnp.float32),   # per-layer hidden states
            jax.ShapeDtypeStruct((B, NC_PAD), jnp.float32),     # padded logits
        ),
        grid=(nb, L),
        in_specs=[
            pl.BlockSpec((R, H), lambda bb, l: (bb, 0)),        # embedding sum
            pl.BlockSpec((1, R, R), lambda bb, l: (bb, 0, 0)),  # additive mask
            cspec((1, H)),                                      # emb LN gamma
            cspec((1, H)),                                      # emb LN beta
            wspec((1, H, 3 * H)),                               # wqkv (bf16, packed)
            wspec((1, 1, 3 * H)),                               # bqkv
            wspec((1, H, H)),                                   # wo (bf16)
            wspec((1, 1, H)),                                   # bo
            wspec((1, 1, H)),                                   # ln1 gamma
            wspec((1, 1, H)),                                   # ln1 beta
            wspec((1, H, I)),                                   # w1 (bf16)
            wspec((1, 1, I)),                                   # b1
            wspec((1, I, H)),                                   # w2 (bf16)
            wspec((1, 1, H)),                                   # b2
            wspec((1, 1, H)),                                   # ln2 gamma
            wspec((1, 1, H)),                                   # ln2 beta
            cspec((H, D1)),                                     # fc_w (bf16)
            cspec((1, D1)),                                     # fc_b
            cspec((D1, NC_PAD)),                                # out_w (bf16, lane-padded)
            cspec((1, NC_PAD)),                                 # out_b (lane-padded)
        ],
        out_specs=(
            pl.BlockSpec((1, R, H), lambda bb, l: (bb, 0, 0)),        # written at l==0
            pl.BlockSpec((1, 1, R, H), lambda bb, l: (l, bb, 0, 0)),  # written every layer
            pl.BlockSpec((BB, NC_PAD), lambda bb, l: (bb, 0)),        # written at l==L-1
        ),
        scratch_shapes=[pltpu.VMEM((R, H), jnp.float32)],       # x carried across layers
        compiler_params=pltpu.CompilerParams(
            dimension_semantics=("parallel", "arbitrary")),
    )(emb_flat, neg_mask, params["emb_ln_g"], params["emb_ln_b"],
      params["wqkv"], params["bqkv"], params["wo"], params["bo"],
      params["ln1_g"], params["ln1_b"], params["w1"], params["b1"],
      params["w2"], params["b2"], params["ln2_g"], params["ln2_b"],
      params["fc_w"], params["fc_b"], params["out_w_pad"], params["out_b_pad"])

    hidden0 = o_emb.reshape(B, S, H)
    layer_hidden = o_layers.reshape(L, B, S, H)
    return hidden0, layer_hidden, logits_pad


# ----------------------------- model -----------------------------

CFG = dict(
    vocab_size=64,
    max_pos=16,
    type_vocab=2,
    hidden=32,        # == hidden_dim
    num_layers=2,
    num_heads=4,
    intermediate=64,
    hidden_dim_1=16,
    num_classes=3,
)


def init_params(key, cfg):
    H = cfg["hidden"]
    I = cfg["intermediate"]
    D1 = cfg["hidden_dim_1"]
    NC = cfg["num_classes"]
    L = cfg["num_layers"]

    def nrm(k, shape, scale=0.02):
        return scale * jax.random.normal(k, shape, dtype=jnp.float32)

    keys = iter(jax.random.split(key, 32))
    out_w = nrm(next(keys), (D1, NC))
    bf16 = lambda a: a.astype(jnp.bfloat16)     # matmul weights stored bf16 in HBM
    return {
        "word_emb": nrm(next(keys), (cfg["vocab_size"], H)),
        "pos_emb": nrm(next(keys), (cfg["max_pos"], H)),
        "type_emb": nrm(next(keys), (cfg["type_vocab"], H)),
        "emb_ln_g": jnp.ones((1, H), jnp.float32),
        "emb_ln_b": jnp.zeros((1, H), jnp.float32),
        # per-layer weights stacked along a leading L axis; QKV packed to (H, 3H)
        "wqkv": bf16(nrm(next(keys), (L, H, 3 * H))),
        "bqkv": jnp.zeros((L, 1, 3 * H), jnp.float32),
        "wo": bf16(nrm(next(keys), (L, H, H))),
        "bo": jnp.zeros((L, 1, H), jnp.float32),
        "ln1_g": jnp.ones((L, 1, H), jnp.float32),
        "ln1_b": jnp.zeros((L, 1, H), jnp.float32),
        "w1": bf16(nrm(next(keys), (L, H, I))),
        "b1": jnp.zeros((L, 1, I), jnp.float32),
        "w2": bf16(nrm(next(keys), (L, I, H))),
        "b2": jnp.zeros((L, 1, H), jnp.float32),
        "ln2_g": jnp.ones((L, 1, H), jnp.float32),
        "ln2_b": jnp.zeros((L, 1, H), jnp.float32),
        "fc_w": bf16(nrm(next(keys), (H, D1))),
        "fc_b": jnp.zeros((1, D1), jnp.float32),
        # lane-dense padded classifier weights (real logits = [:, :NC])
        "out_w_pad": bf16(jnp.pad(out_w, ((0, 0), (0, NC_PAD - NC)))),
        "out_b_pad": jnp.zeros((1, NC_PAD), jnp.float32),
    }


def bert_model_classifier_forward(params, input_ids, attention_mask,
                                  token_type_ids, cfg):
    B, S = input_ids.shape

    # Embedding gathers stay in plain JAX (table lookups, not a Pallas hot path).
    emb = (params["word_emb"][input_ids]
           + params["pos_emb"][jnp.arange(S)][None, :, :]
           + params["type_emb"][token_type_ids])                 # (B, S, H)

    hidden0, layer_hidden, logits_pad = bert_stack(emb, attention_mask, params, cfg)

    # output_hidden_states=True -> (embedding output, layer outputs...)
    hiddn_state = (hidden0,) + tuple(layer_hidden[i]
                                     for i in range(cfg["num_layers"]))
    # TODO(synk): self.drop (Dropout) is declared in __init__ but never applied
    # in the reference forward(), so it is intentionally omitted here.
    output = logits_pad[:, :cfg["num_classes"]]
    return output, hiddn_state


# ----------------------------- driver -----------------------------

if __name__ == "__main__":
    key = jax.random.PRNGKey(0)
    k_param, k_ids, k_type = jax.random.split(key, 3)

    B, S = 2, 8
    params = init_params(k_param, CFG)

    input_ids = jax.random.randint(k_ids, (B, S), 0, CFG["vocab_size"],
                                   dtype=jnp.int32)
    attention_mask = jnp.ones((B, S), jnp.int32).at[:, -2:].set(0)  # pad last 2
    token_type_ids = jax.random.randint(k_type, (B, S), 0, CFG["type_vocab"],
                                        dtype=jnp.int32)

    fwd = jax.jit(functools.partial(bert_model_classifier_forward, cfg=CFG))
    logits, hidden_states = fwd(params, input_ids, attention_mask,
                                token_type_ids)
    jax.block_until_ready(logits)
    jax.block_until_ready(hidden_states)

    assert logits.shape == (B, CFG["num_classes"])
    assert len(hidden_states) == CFG["num_layers"] + 1
    assert all(h.shape == (B, S, CFG["hidden"]) for h in hidden_states)
    assert bool(jnp.all(jnp.isfinite(logits)))
    assert all(bool(jnp.all(jnp.isfinite(h))) for h in hidden_states)

    print("KERNEL_OK")
</pallas_src>

<mosaic_0001>
module attributes {stable_mosaic.version = 11 : i64} {
  func.func @_bert_stack_kernel(%arg0: i32, %arg1: i32, %arg2: memref<16x32xf32, #tpu.memory_space<vmem>>, %arg3: memref<1x16x16xf32, #tpu.memory_space<vmem>>, %arg4: memref<1x32xf32, #tpu.memory_space<vmem>>, %arg5: memref<1x32xf32, #tpu.memory_space<vmem>>, %arg6: memref<1x32x96xbf16, #tpu.memory_space<vmem>>, %arg7: memref<1x1x96xf32, #tpu.memory_space<vmem>>, %arg8: memref<1x32x32xbf16, #tpu.memory_space<vmem>>, %arg9: memref<1x1x32xf32, #tpu.memory_space<vmem>>, %arg10: memref<1x1x32xf32, #tpu.memory_space<vmem>>, %arg11: memref<1x1x32xf32, #tpu.memory_space<vmem>>, %arg12: memref<1x32x64xbf16, #tpu.memory_space<vmem>>, %arg13: memref<1x1x64xf32, #tpu.memory_space<vmem>>, %arg14: memref<1x64x32xbf16, #tpu.memory_space<vmem>>, %arg15: memref<1x1x32xf32, #tpu.memory_space<vmem>>, %arg16: memref<1x1x32xf32, #tpu.memory_space<vmem>>, %arg17: memref<1x1x32xf32, #tpu.memory_space<vmem>>, %arg18: memref<32x16xbf16, #tpu.memory_space<vmem>>, %arg19: memref<1x16xf32, #tpu.memory_space<vmem>>, %arg20: memref<16x128xbf16, #tpu.memory_space<vmem>>, %arg21: memref<1x128xf32, #tpu.memory_space<vmem>>, %arg22: memref<1x16x32xf32, #tpu.memory_space<vmem>>, %arg23: memref<1x1x16x32xf32, #tpu.memory_space<vmem>>, %arg24: memref<2x128xf32, #tpu.memory_space<vmem>>, %arg25: memref<16x32xf32, #tpu.memory_space<vmem>>) attributes {dimension_semantics = [#tpu.dimension_semantics<parallel>, #tpu.dimension_semantics<arbitrary>], iteration_bounds = array<i64: 1, 2>, scalar_prefetch = 0 : i64, scratch_operands = 1 : i64, tpu.core_type = #tpu.core_type<tc>, window_params = [{transform_indices = @transform_0, window_bounds = array<i64: 16, 32>}, {transform_indices = @transform_1, window_bounds = array<i64: 1, 16, 16>}, {pipeline_mode = #tpu.pipeline_mode<synchronous>, transform_indices = @transform_2, window_bounds = array<i64: 1, 32>}, {pipeline_mode = #tpu.pipeline_mode<synchronous>, transform_indices = @transform_3, window_bounds = array<i64: 1, 32>}, {transform_indices = @transform_4, window_bounds = array<i64: 1, 32, 96>}, {transform_indices = @transform_5, window_bounds = array<i64: 1, 1, 96>}, {transform_indices = @transform_6, window_bounds = array<i64: 1, 32, 32>}, {transform_indices = @transform_7, window_bounds = array<i64: 1, 1, 32>}, {transform_indices = @transform_8, window_bounds = array<i64: 1, 1, 32>}, {transform_indices = @transform_9, window_bounds = array<i64: 1, 1, 32>}, {transform_indices = @transform_10, window_bounds = array<i64: 1, 32, 64>}, {transform_indices = @transform_11, window_bounds = array<i64: 1, 1, 64>}, {transform_indices = @transform_12, window_bounds = array<i64: 1, 64, 32>}, {transform_indices = @transform_13, window_bounds = array<i64: 1, 1, 32>}, {transform_indices = @transform_14, window_bounds = array<i64: 1, 1, 32>}, {transform_indices = @transform_15, window_bounds = array<i64: 1, 1, 32>}, {pipeline_mode = #tpu.pipeline_mode<synchronous>, transform_indices = @transform_16, window_bounds = array<i64: 32, 16>}, {pipeline_mode = #tpu.pipeline_mode<synchronous>, transform_indices = @transform_17, window_bounds = array<i64: 1, 16>}, {pipeline_mode = #tpu.pipeline_mode<synchronous>, transform_indices = @transform_18, window_bounds = array<i64: 16, 128>}, {pipeline_mode = #tpu.pipeline_mode<synchronous>, transform_indices = @transform_19, window_bounds = array<i64: 1, 128>}, {transform_indices = @transform_20, window_bounds = array<i64: 1, 16, 32>}, {transform_indices = @transform_21, window_bounds = array<i64: 1, 1, 16, 32>}, {transform_indices = @transform_22, window_bounds = array<i64: 2, 128>}]} {
    %c0_i32 = arith.constant 0 : i32
    %0 = arith.cmpi eq, %arg1, %c0_i32 : i32
    %1 = arith.extui %0 : i1 to i32
    %c0_i32_0 = arith.constant 0 : i32
    %2 = arith.cmpi ne, %1, %c0_i32_0 : i32
    scf.if %2 {
      %c0_85 = arith.constant 0 : index
      %c0_86 = arith.constant 0 : index
      %189 = vector.load %arg2[%c0_85, %c0_86] : memref<16x32xf32, #tpu.memory_space<vmem>>, vector<16x32xf32>
      %c0_87 = arith.constant 0 : index
      %c0_88 = arith.constant 0 : index
      %190 = vector.load %arg4[%c0_87, %c0_88] : memref<1x32xf32, #tpu.memory_space<vmem>>, vector<1x32xf32>
      %c0_89 = arith.constant 0 : index
      %c0_90 = arith.constant 0 : index
      %191 = vector.load %arg5[%c0_89, %c0_90] : memref<1x32xf32, #tpu.memory_space<vmem>>, vector<1x32xf32>
      %cst_91 = arith.constant dense<0.000000e+00> : vector<16xf32>
      %192 = vector.multi_reduction <add>, %189, %cst_91 [1] : vector<16x32xf32> to vector<16xf32>
      %193 = vector.shape_cast %192 : vector<16xf32> to vector<16x1xf32>
      %cst_92 = arith.constant 3.200000e+01 : f32
      %194 = vector.broadcast %cst_92 : f32 to vector<16x1xf32>
      %195 = arith.divf %193, %194 : vector<16x1xf32>
      %196 = vector.broadcast %195 : vector<16x1xf32> to vector<16x32xf32>
      %197 = arith.subf %189, %196 : vector<16x32xf32>
      %198 = arith.mulf %197, %197 : vector<16x32xf32>
      %cst_93 = arith.constant dense<0.000000e+00> : vector<16xf32>
      %199 = vector.multi_reduction <add>, %198, %cst_93 [1] : vector<16x32xf32> to vector<16xf32>
      %200 = vector.shape_cast %199 : vector<16xf32> to vector<16x1xf32>
      %cst_94 = arith.constant 3.200000e+01 : f32
      %201 = vector.broadcast %cst_94 : f32 to vector<16x1xf32>
      %202 = arith.divf %200, %201 : vector<16x1xf32>
      %203 = vector.broadcast %195 : vector<16x1xf32> to vector<16x32xf32>
      %204 = arith.subf %189, %203 : vector<16x32xf32>
      %cst_95 = arith.constant 9.99999996E-13 : f32
      %205 = vector.broadcast %cst_95 : f32 to vector<16x1xf32>
      %206 = arith.addf %202, %205 : vector<16x1xf32>
      %207 = math.rsqrt %206 : vector<16x1xf32>
      %208 = vector.broadcast %207 : vector<16x1xf32> to vector<16x32xf32>
      %209 = arith.mulf %204, %208 : vector<16x32xf32>
      %210 = vector.broadcast %190 : vector<1x32xf32> to vector<16x32xf32>
      %211 = arith.mulf %209, %210 : vector<16x32xf32>
      %212 = vector.broadcast %191 : vector<1x32xf32> to vector<16x32xf32>
      %213 = arith.addf %211, %212 : vector<16x32xf32>
      %c0_96 = arith.constant 0 : index
      %c0_97 = arith.constant 0 : index
      %214 = vector.load %arg25[%c0_96, %c0_97] : memref<16x32xf32, #tpu.memory_space<vmem>>, vector<16x32xf32>
      tpu.vector_store %arg25[%c0_96, %c0_97], %213 {strides = array<i32>} : memref<16x32xf32, #tpu.memory_space<vmem>>, vector<16x32xf32>,
      %c0_98 = arith.constant 0 : index
      %c0_99 = arith.constant 0 : index
      %c0_100 = arith.constant 0 : index
      %215 = vector.load %arg22[%c0_98, %c0_99, %c0_100] : memref<1x16x32xf32, #tpu.memory_space<vmem>>, vector<1x16x32xf32>
      %216 = vector.shape_cast %215 : vector<1x16x32xf32> to vector<16x32xf32>
      %217 = vector.shape_cast %213 : vector<16x32xf32> to vector<1x16x32xf32>
      tpu.vector_store %arg22[%c0_98, %c0_99, %c0_100], %217 {strides = array<i32>} : memref<1x16x32xf32, #tpu.memory_space<vmem>>, vector<1x16x32xf32>,
    } else {
    }
    %c0 = arith.constant 0 : index
    %c0_1 = arith.constant 0 : index
    %3 = vector.load %arg25[%c0, %c0_1] : memref<16x32xf32, #tpu.memory_space<vmem>>, vector<16x32xf32>
    %c0_2 = arith.constant 0 : index
    %c0_3 = arith.constant 0 : index
    %c0_4 = arith.constant 0 : index
    %4 = vector.load %arg6[%c0_2, %c0_3, %c0_4] : memref<1x32x96xbf16, #tpu.memory_space<vmem>>, vector<1x32x96xbf16>
    %5 = vector.shape_cast %4 : vector<1x32x96xbf16> to vector<32x96xbf16>
    %6 = arith.truncf %3 : vector<16x32xf32> to vector<16x32xbf16>
    %cst = arith.constant dense<0.000000e+00> : vector<16x96xf32>
    %7 = tpu.matmul %6, %5, %cst {dimension_numbers = #tpu.dot_dimension_numbers<[1], [0], [0], [1], [0, 0, 1, 1], [], []>} : vector<16x32xbf16>, vector<32x96xbf16>, vector<16x96xf32> -> vector<16x96xf32>
    %c0_5 = arith.constant 0 : index
    %c0_6 = arith.constant 0 : index
    %c0_7 = arith.constant 0 : index
    %8 = vector.load %arg7[%c0_5, %c0_6, %c0_7] : memref<1x1x96xf32, #tpu.memory_space<vmem>>, vector<1x1x96xf32>
    %9 = vector.shape_cast %8 : vector<1x1x96xf32> to vector<1x96xf32>
    %10 = vector.broadcast %9 : vector<1x96xf32> to vector<16x96xf32>
    %11 = arith.addf %7, %10 : vector<16x96xf32>
    %c0_8 = arith.constant 0 : index
    %c0_9 = arith.constant 0 : index
    %c0_10 = arith.constant 0 : index
    %12 = vector.load %arg3[%c0_8, %c0_9, %c0_10] : memref<1x16x16xf32, #tpu.memory_space<vmem>>, vector<1x16x16xf32>
    %13 = vector.shape_cast %12 : vector<1x16x16xf32> to vector<16x16xf32>
    %14 = vector.extract_strided_slice %11 {offsets = [0, 0], sizes = [16, 8], strides = [1, 1]} : vector<16x96xf32> to vector<16x8xf32>
    %15 = vector.extract_strided_slice %11 {offsets = [0, 32], sizes = [16, 8], strides = [1, 1]} : vector<16x96xf32> to vector<16x8xf32>
    %16 = vector.extract_strided_slice %11 {offsets = [0, 64], sizes = [16, 8], strides = [1, 1]} : vector<16x96xf32> to vector<16x8xf32>
    %17 = tpu.transpose %15, [1, 0] : vector<16x8xf32> -> vector<8x16xf32>
    %cst_11 = arith.constant dense<0.000000e+00> : vector<16x16xf32>
    %18 = tpu.matmul %14, %17, %cst_11 {dimension_numbers = #tpu.dot_dimension_numbers<[1], [0], [0], [1], [0, 0, 1, 1], [], []>} : vector<16x8xf32>, vector<8x16xf32>, vector<16x16xf32> -> vector<16x16xf32>
    %cst_12 = arith.constant 0.353553385 : f32
    %19 = vector.broadcast %cst_12 : f32 to vector<16x16xf32>
    %20 = arith.mulf %18, %19 : vector<16x16xf32>
    %21 = arith.addf %20, %13 : vector<16x16xf32>
    %cst_13 = arith.constant dense<0xFF800000> : vector<16xf32>
    %22 = vector.multi_reduction <maximumf>, %21, %cst_13 [1] : vector<16x16xf32> to vector<16xf32>
    %23 = vector.shape_cast %22 : vector<16xf32> to vector<16x1xf32>
    %24 = vector.broadcast %23 : vector<16x1xf32> to vector<16x16xf32>
    %25 = arith.subf %21, %24 : vector<16x16xf32>
    %26 = math.exp %25 : vector<16x16xf32>
    %cst_14 = arith.constant dense<0.000000e+00> : vector<16xf32>
    %27 = vector.multi_reduction <add>, %26, %cst_14 [1] : vector<16x16xf32> to vector<16xf32>
    %28 = vector.shape_cast %27 : vector<16xf32> to vector<16x1xf32>
    %29 = tpu.reciprocal %28 {approx = true} : vector<16x1xf32> -> vector<16x1xf32>
    %30 = vector.broadcast %29 : vector<16x1xf32> to vector<16x16xf32>
    %31 = arith.mulf %26, %30 : vector<16x16xf32>
    %cst_15 = arith.constant dense<0.000000e+00> : vector<16x8xf32>
    %32 = tpu.matmul %31, %16, %cst_15 {dimension_numbers = #tpu.dot_dimension_numbers<[1], [0], [0], [1], [0, 0, 1, 1], [], []>} : vector<16x16xf32>, vector<16x8xf32>, vector<16x8xf32> -> vector<16x8xf32>
    %33 = vector.extract_strided_slice %11 {offsets = [0, 8], sizes = [16, 8], strides = [1, 1]} : vector<16x96xf32> to vector<16x8xf32>
    %34 = vector.extract_strided_slice %11 {offsets = [0, 40], sizes = [16, 8], strides = [1, 1]} : vector<16x96xf32> to vector<16x8xf32>
    %35 = vector.extract_strided_slice %11 {offsets = [0, 72], sizes = [16, 8], strides = [1, 1]} : vector<16x96xf32> to vector<16x8xf32>
    %36 = tpu.transpose %34, [1, 0] : vector<16x8xf32> -> vector<8x16xf32>
    %cst_16 = arith.constant dense<0.000000e+00> : vector<16x16xf32>
    %37 = tpu.matmul %33, %36, %cst_16 {dimension_numbers = #tpu.dot_dimension_numbers<[1], [0], [0], [1], [0, 0, 1, 1], [], []>} : vector<16x8xf32>, vector<8x16xf32>, vector<16x16xf32> -> vector<16x16xf32>
    %cst_17 = arith.constant 0.353553385 : f32
    %38 = vector.broadcast %cst_17 : f32 to vector<16x16xf32>
    %39 = arith.mulf %37, %38 : vector<16x16xf32>
    %40 = arith.addf %39, %13 : vector<16x16xf32>
    %cst_18 = arith.constant dense<0xFF800000> : vector<16xf32>
    %41 = vector.multi_reduction <maximumf>, %40, %cst_18 [1] : vector<16x16xf32> to vector<16xf32>
    %42 = vector.shape_cast %41 : vector<16xf32> to vector<16x1xf32>
    %43 = vector.broadcast %42 : vector<16x1xf32> to vector<16x16xf32>
    %44 = arith.subf %40, %43 : vector<16x16xf32>
    %45 = math.exp %44 : vector<16x16xf32>
    %cst_19 = arith.constant dense<0.000000e+00> : vector<16xf32>
    %46 = vector.multi_reduction <add>, %45, %cst_19 [1] : vector<16x16xf32> to vector<16xf32>
    %47 = vector.shape_cast %46 : vector<16xf32> to vector<16x1xf32>
    %48 = tpu.reciprocal %47 {approx = true} : vector<16x1xf32> -> vector<16x1xf32>
    %49 = vector.broadcast %48 : vector<16x1xf32> to vector<16x16xf32>
    %50 = arith.mulf %45, %49 : vector<16x16xf32>
    %cst_20 = arith.constant dense<0.000000e+00> : vector<16x8xf32>
    %51 = tpu.matmul %50, %35, %cst_20 {dimension_numbers = #tpu.dot_dimension_numbers<[1], [0], [0], [1], [0, 0, 1, 1], [], []>} : vector<16x16xf32>, vector<16x8xf32>, vector<16x8xf32> -> vector<16x8xf32>
    %52 = vector.extract_strided_slice %11 {offsets = [0, 16], sizes = [16, 8], strides = [1, 1]} : vector<16x96xf32> to vector<16x8xf32>
    %53 = vector.extract_strided_slice %11 {offsets = [0, 48], sizes = [16, 8], strides = [1, 1]} : vector<16x96xf32> to vector<16x8xf32>
    %54 = vector.extract_strided_slice %11 {offsets = [0, 80], sizes = [16, 8], strides = [1, 1]} : vector<16x96xf32> to vector<16x8xf32>
    %55 = tpu.transpose %53, [1, 0] : vector<16x8xf32> -> vector<8x16xf32>
    %cst_21 = arith.constant dense<0.000000e+00> : vector<16x16xf32>
    %56 = tpu.matmul %52, %55, %cst_21 {dimension_numbers = #tpu.dot_dimension_numbers<[1], [0], [0], [1], [0, 0, 1, 1], [], []>} : vector<16x8xf32>, vector<8x16xf32>, vector<16x16xf32> -> vector<16x16xf32>
    %cst_22 = arith.constant 0.353553385 : f32
    %57 = vector.broadcast %cst_22 : f32 to vector<16x16xf32>
    %58 = arith.mulf %56, %57 : vector<16x16xf32>
    %59 = arith.addf %58, %13 : vector<16x16xf32>
    %cst_23 = arith.constant dense<0xFF800000> : vector<16xf32>
    %60 = vector.multi_reduction <maximumf>, %59, %cst_23 [1] : vector<16x16xf32> to vector<16xf32>
    %61 = vector.shape_cast %60 : vector<16xf32> to vector<16x1xf32>
    %62 = vector.broadcast %61 : vector<16x1xf32> to vector<16x16xf32>
    %63 = arith.subf %59, %62 : vector<16x16xf32>
    %64 = math.exp %63 : vector<16x16xf32>
    %cst_24 = arith.constant dense<0.000000e+00> : vector<16xf32>
    %65 = vector.multi_reduction <add>, %64, %cst_24 [1] : vector<16x16xf32> to vector<16xf32>
    %66 = vector.shape_cast %65 : vector<16xf32> to vector<16x1xf32>
    %67 = tpu.reciprocal %66 {approx = true} : vector<16x1xf32> -> vector<16x1xf32>
    %68 = vector.broadcast %67 : vector<16x1xf32> to vector<16x16xf32>
    %69 = arith.mulf %64, %68 : vector<16x16xf32>
    %cst_25 = arith.constant dense<0.000000e+00> : vector<16x8xf32>
    %70 = tpu.matmul %69, %54, %cst_25 {dimension_numbers = #tpu.dot_dimension_numbers<[1], [0], [0], [1], [0, 0, 1, 1], [], []>} : vector<16x16xf32>, vector<16x8xf32>, vector<16x8xf32> -> vector<16x8xf32>
    %71 = vector.extract_strided_slice %11 {offsets = [0, 24], sizes = [16, 8], strides = [1, 1]} : vector<16x96xf32> to vector<16x8xf32>
    %72 = vector.extract_strided_slice %11 {offsets = [0, 56], sizes = [16, 8], strides = [1, 1]} : vector<16x96xf32> to vector<16x8xf32>
    %73 = vector.extract_strided_slice %11 {offsets = [0, 88], sizes = [16, 8], strides = [1, 1]} : vector<16x96xf32> to vector<16x8xf32>
    %74 = tpu.transpose %72, [1, 0] : vector<16x8xf32> -> vector<8x16xf32>
    %cst_26 = arith.constant dense<0.000000e+00> : vector<16x16xf32>
    %75 = tpu.matmul %71, %74, %cst_26 {dimension_numbers = #tpu.dot_dimension_numbers<[1], [0], [0], [1], [0, 0, 1, 1], [], []>} : vector<16x8xf32>, vector<8x16xf32>, vector<16x16xf32> -> vector<16x16xf32>
    %cst_27 = arith.constant 0.353553385 : f32
    %76 = vector.broadcast %cst_27 : f32 to vector<16x16xf32>
    %77 = arith.mulf %75, %76 : vector<16x16xf32>
    %78 = arith.addf %77, %13 : vector<16x16xf32>
    %cst_28 = arith.constant dense<0xFF800000> : vector<16xf32>
    %79 = vector.multi_reduction <maximumf>, %78, %cst_28 [1] : vector<16x16xf32> to vector<16xf32>
    %80 = vector.shape_cast %79 : vector<16xf32> to vector<16x1xf32>
    %81 = vector.broadcast %80 : vector<16x1xf32> to vector<16x16xf32>
    %82 = arith.subf %78, %81 : vector<16x16xf32>
    %83 = math.exp %82 : vector<16x16xf32>
    %cst_29 = arith.constant dense<0.000000e+00> : vector<16xf32>
    %84 = vector.multi_reduction <add>, %83, %cst_29 [1] : vector<16x16xf32> to vector<16xf32>
    %85 = vector.shape_cast %84 : vector<16xf32> to vector<16x1xf32>
    %86 = tpu.reciprocal %85 {approx = true} : vector<16x1xf32> -> vector<16x1xf32>
    %87 = vector.broadcast %86 : vector<16x1xf32> to vector<16x16xf32>
    %88 = arith.mulf %83, %87 : vector<16x16xf32>
    %cst_30 = arith.constant dense<0.000000e+00> : vector<16x8xf32>
    %89 = tpu.matmul %88, %73, %cst_30 {dimension_numbers = #tpu.dot_dimension_numbers<[1], [0], [0], [1], [0, 0, 1, 1], [], []>} : vector<16x16xf32>, vector<16x8xf32>, vector<16x8xf32> -> vector<16x8xf32>
    %90 = tpu.concatenate %32, %51, %70, %89 in 1 : vector<16x8xf32>, vector<16x8xf32>, vector<16x8xf32>, vector<16x8xf32> -> vector<16x32xf32>
    %c0_31 = arith.constant 0 : index
    %c0_32 = arith.constant 0 : index
    %c0_33 = arith.constant 0 : index
    %91 = vector.load %arg8[%c0_31, %c0_32, %c0_33] : memref<1x32x32xbf16, #tpu.memory_space<vmem>>, vector<1x32x32xbf16>
    %92 = vector.shape_cast %91 : vector<1x32x32xbf16> to vector<32x32xbf16>
    %93 = arith.truncf %90 : vector<16x32xf32> to vector<16x32xbf16>
    %cst_34 = arith.constant dense<0.000000e+00> : vector<16x32xf32>
    %94 = tpu.matmul %93, %92, %cst_34 {dimension_numbers = #tpu.dot_dimension_numbers<[1], [0], [0], [1], [0, 0, 1, 1], [], []>} : vector<16x32xbf16>, vector<32x32xbf16>, vector<16x32xf32> -> vector<16x32xf32>
    %c0_35 = arith.constant 0 : index
    %c0_36 = arith.constant 0 : index
    %c0_37 = arith.constant 0 : index
    %95 = vector.load %arg9[%c0_35, %c0_36, %c0_37] : memref<1x1x32xf32, #tpu.memory_space<vmem>>, vector<1x1x32xf32>
    %96 = vector.shape_cast %95 : vector<1x1x32xf32> to vector<1x32xf32>
    %97 = vector.broadcast %96 : vector<1x32xf32> to vector<16x32xf32>
    %98 = arith.addf %94, %97 : vector<16x32xf32>
    %99 = arith.addf %98, %3 : vector<16x32xf32>
    %c0_38 = arith.constant 0 : index
    %c0_39 = arith.constant 0 : index
    %c0_40 = arith.constant 0 : index
    %100 = vector.load %arg10[%c0_38, %c0_39, %c0_40] : memref<1x1x32xf32, #tpu.memory_space<vmem>>, vector<1x1x32xf32>
    %101 = vector.shape_cast %100 : vector<1x1x32xf32> to vector<1x32xf32>
    %c0_41 = arith.constant 0 : index
    %c0_42 = arith.constant 0 : index
    %c0_43 = arith.constant 0 : index
    %102 = vector.load %arg11[%c0_41, %c0_42, %c0_43] : memref<1x1x32xf32, #tpu.memory_space<vmem>>, vector<1x1x32xf32>
    %103 = vector.shape_cast %102 : vector<1x1x32xf32> to vector<1x32xf32>
    %cst_44 = arith.constant dense<0.000000e+00> : vector<16xf32>
    %104 = vector.multi_reduction <add>, %99, %cst_44 [1] : vector<16x32xf32> to vector<16xf32>
    %105 = vector.shape_cast %104 : vector<16xf32> to vector<16x1xf32>
    %cst_45 = arith.constant 3.200000e+01 : f32
    %106 = vector.broadcast %cst_45 : f32 to vector<16x1xf32>
    %107 = arith.divf %105, %106 : vector<16x1xf32>
    %108 = vector.broadcast %107 : vector<16x1xf32> to vector<16x32xf32>
    %109 = arith.subf %99, %108 : vector<16x32xf32>
    %110 = arith.mulf %109, %109 : vector<16x32xf32>
    %cst_46 = arith.constant dense<0.000000e+00> : vector<16xf32>
    %111 = vector.multi_reduction <add>, %110, %cst_46 [1] : vector<16x32xf32> to vector<16xf32>
    %112 = vector.shape_cast %111 : vector<16xf32> to vector<16x1xf32>
    %cst_47 = arith.constant 3.200000e+01 : f32
    %113 = vector.broadcast %cst_47 : f32 to vector<16x1xf32>
    %114 = arith.divf %112, %113 : vector<16x1xf32>
    %115 = vector.broadcast %107 : vector<16x1xf32> to vector<16x32xf32>
    %116 = arith.subf %99, %115 : vector<16x32xf32>
    %cst_48 = arith.constant 9.99999996E-13 : f32
    %117 = vector.broadcast %cst_48 : f32 to vector<16x1xf32>
    %118 = arith.addf %114, %117 : vector<16x1xf32>
    %119 = math.rsqrt %118 : vector<16x1xf32>
    %120 = vector.broadcast %119 : vector<16x1xf32> to vector<16x32xf32>
    %121 = arith.mulf %116, %120 : vector<16x32xf32>
    %122 = vector.broadcast %101 : vector<1x32xf32> to vector<16x32xf32>
    %123 = arith.mulf %121, %122 : vector<16x32xf32>
    %124 = vector.broadcast %103 : vector<1x32xf32> to vector<16x32xf32>
    %125 = arith.addf %123, %124 : vector<16x32xf32>
    %c0_49 = arith.constant 0 : index
    %c0_50 = arith.constant 0 : index
    %c0_51 = arith.constant 0 : index
    %126 = vector.load %arg12[%c0_49, %c0_50, %c0_51] : memref<1x32x64xbf16, #tpu.memory_space<vmem>>, vector<1x32x64xbf16>
    %127 = vector.shape_cast %126 : vector<1x32x64xbf16> to vector<32x64xbf16>
    %128 = arith.truncf %125 : vector<16x32xf32> to vector<16x32xbf16>
    %cst_52 = arith.constant dense<0.000000e+00> : vector<16x64xf32>
    %129 = tpu.matmul %128, %127, %cst_52 {dimension_numbers = #tpu.dot_dimension_numbers<[1], [0], [0], [1], [0, 0, 1, 1], [], []>} : vector<16x32xbf16>, vector<32x64xbf16>, vector<16x64xf32> -> vector<16x64xf32>
    %c0_53 = arith.constant 0 : index
    %c0_54 = arith.constant 0 : index
    %c0_55 = arith.constant 0 : index
    %130 = vector.load %arg13[%c0_53, %c0_54, %c0_55] : memref<1x1x64xf32, #tpu.memory_space<vmem>>, vector<1x1x64xf32>
    %131 = vector.shape_cast %130 : vector<1x1x64xf32> to vector<1x64xf32>
    %132 = vector.broadcast %131 : vector<1x64xf32> to vector<16x64xf32>
    %133 = arith.addf %129, %132 : vector<16x64xf32>
    %134 = arith.mulf %133, %133 : vector<16x64xf32>
    %135 = arith.mulf %133, %134 : vector<16x64xf32>
    %cst_56 = arith.constant 4.471500e-02 : f32
    %136 = vector.broadcast %cst_56 : f32 to vector<16x64xf32>
    %137 = arith.mulf %136, %135 : vector<16x64xf32>
    %138 = arith.addf %133, %137 : vector<16x64xf32>
    %cst_57 = arith.constant 0.797884583 : f32
    %139 = vector.broadcast %cst_57 : f32 to vector<16x64xf32>
    %140 = arith.mulf %139, %138 : vector<16x64xf32>
    %141 = math.tanh %140 : vector<16x64xf32>
    %cst_58 = arith.constant 1.000000e+00 : f32
    %142 = vector.broadcast %cst_58 : f32 to vector<16x64xf32>
    %143 = arith.addf %142, %141 : vector<16x64xf32>
    %cst_59 = arith.constant 5.000000e-01 : f32
    %144 = vector.broadcast %cst_59 : f32 to vector<16x64xf32>
    %145 = arith.mulf %144, %143 : vector<16x64xf32>
    %146 = arith.mulf %133, %145 : vector<16x64xf32>
    %c0_60 = arith.constant 0 : index
    %c0_61 = arith.constant 0 : index
    %c0_62 = arith.constant 0 : index
    %147 = vector.load %arg14[%c0_60, %c0_61, %c0_62] : memref<1x64x32xbf16, #tpu.memory_space<vmem>>, vector<1x64x32xbf16>
    %148 = vector.shape_cast %147 : vector<1x64x32xbf16> to vector<64x32xbf16>
    %149 = arith.truncf %146 : vector<16x64xf32> to vector<16x64xbf16>
    %cst_63 = arith.constant dense<0.000000e+00> : vector<16x32xf32>
    %150 = tpu.matmul %149, %148, %cst_63 {dimension_numbers = #tpu.dot_dimension_numbers<[1], [0], [0], [1], [0, 0, 1, 1], [], []>} : vector<16x64xbf16>, vector<64x32xbf16>, vector<16x32xf32> -> vector<16x32xf32>
    %c0_64 = arith.constant 0 : index
    %c0_65 = arith.constant 0 : index
    %c0_66 = arith.constant 0 : index
    %151 = vector.load %arg15[%c0_64, %c0_65, %c0_66] : memref<1x1x32xf32, #tpu.memory_space<vmem>>, vector<1x1x32xf32>
    %152 = vector.shape_cast %151 : vector<1x1x32xf32> to vector<1x32xf32>
    %153 = vector.broadcast %152 : vector<1x32xf32> to vector<16x32xf32>
    %154 = arith.addf %150, %153 : vector<16x32xf32>
    %155 = arith.addf %154, %125 : vector<16x32xf32>
    %c0_67 = arith.constant 0 : index
    %c0_68 = arith.constant 0 : index
    %c0_69 = arith.constant 0 : index
    %156 = vector.load %arg16[%c0_67, %c0_68, %c0_69] : memref<1x1x32xf32, #tpu.memory_space<vmem>>, vector<1x1x32xf32>
    %157 = vector.shape_cast %156 : vector<1x1x32xf32> to vector<1x32xf32>
    %c0_70 = arith.constant 0 : index
    %c0_71 = arith.constant 0 : index
    %c0_72 = arith.constant 0 : index
    %158 = vector.load %arg17[%c0_70, %c0_71, %c0_72] : memref<1x1x32xf32, #tpu.memory_space<vmem>>, vector<1x1x32xf32>
    %159 = vector.shape_cast %158 : vector<1x1x32xf32> to vector<1x32xf32>
    %cst_73 = arith.constant dense<0.000000e+00> : vector<16xf32>
    %160 = vector.multi_reduction <add>, %155, %cst_73 [1] : vector<16x32xf32> to vector<16xf32>
    %161 = vector.shape_cast %160 : vector<16xf32> to vector<16x1xf32>
    %cst_74 = arith.constant 3.200000e+01 : f32
    %162 = vector.broadcast %cst_74 : f32 to vector<16x1xf32>
    %163 = arith.divf %161, %162 : vector<16x1xf32>
    %164 = vector.broadcast %163 : vector<16x1xf32> to vector<16x32xf32>
    %165 = arith.subf %155, %164 : vector<16x32xf32>
    %166 = arith.mulf %165, %165 : vector<16x32xf32>
    %cst_75 = arith.constant dense<0.000000e+00> : vector<16xf32>
    %167 = vector.multi_reduction <add>, %166, %cst_75 [1] : vector<16x32xf32> to vector<16xf32>
    %168 = vector.shape_cast %167 : vector<16xf32> to vector<16x1xf32>
    %cst_76 = arith.constant 3.200000e+01 : f32
    %169 = vector.broadcast %cst_76 : f32 to vector<16x1xf32>
    %170 = arith.divf %168, %169 : vector<16x1xf32>
    %171 = vector.broadcast %163 : vector<16x1xf32> to vector<16x32xf32>
    %172 = arith.subf %155, %171 : vector<16x32xf32>
    %cst_77 = arith.constant 9.99999996E-13 : f32
    %173 = vector.broadcast %cst_77 : f32 to vector<16x1xf32>
    %174 = arith.addf %170, %173 : vector<16x1xf32>
    %175 = math.rsqrt %174 : vector<16x1xf32>
    %176 = vector.broadcast %175 : vector<16x1xf32> to vector<16x32xf32>
    %177 = arith.mulf %172, %176 : vector<16x32xf32>
    %178 = vector.broadcast %157 : vector<1x32xf32> to vector<16x32xf32>
    %179 = arith.mulf %177, %178 : vector<16x32xf32>
    %180 = vector.broadcast %159 : vector<1x32xf32> to vector<16x32xf32>
    %181 = arith.addf %179, %180 : vector<16x32xf32>
    %c0_78 = arith.constant 0 : index
    %c0_79 = arith.constant 0 : index
    %182 = vector.load %arg25[%c0_78, %c0_79] : memref<16x32xf32, #tpu.memory_space<vmem>>, vector<16x32xf32>
    tpu.vector_store %arg25[%c0_78, %c0_79], %181 {strides = array<i32>} : memref<16x32xf32, #tpu.memory_space<vmem>>, vector<16x32xf32>,
    %c0_80 = arith.constant 0 : index
    %c0_81 = arith.constant 0 : index
    %c0_82 = arith.constant 0 : index
    %c0_83 = arith.constant 0 : index
    %183 = vector.load %arg23[%c0_80, %c0_81, %c0_82, %c0_83] : memref<1x1x16x32xf32, #tpu.memory_space<vmem>>, vector<1x1x16x32xf32>
    %184 = vector.shape_cast %183 : vector<1x1x16x32xf32> to vector<16x32xf32>
    %185 = vector.shape_cast %181 : vector<16x32xf32> to vector<1x1x16x32xf32>
    tpu.vector_store %arg23[%c0_80, %c0_81, %c0_82, %c0_83], %185 {strides = array<i32>} : memref<1x1x16x32xf32, #tpu.memory_space<vmem>>, vector<1x1x16x32xf32>,
    %c1_i32 = arith.constant 1 : i32
    %186 = arith.cmpi eq, %arg1, %c1_i32 : i32
    %187 = arith.extui %186 : i1 to i32
    %c0_i32_84 = arith.constant 0 : i32
    %188 = arith.cmpi ne, %187, %c0_i32_84 : i32
    scf.if %188 {
      %189 = vector.extract_strided_slice %181 {offsets = [0, 0], sizes = [1, 32], strides = [1, 1]} : vector<16x32xf32> to vector<1x32xf32>
      %190 = vector.extract_strided_slice %181 {offsets = [8, 0], sizes = [1, 32], strides = [1, 1]} : vector<16x32xf32> to vector<1x32xf32>
      %191 = tpu.concatenate %189, %190 in 0 : vector<1x32xf32>, vector<1x32xf32> -> vector<2x32xf32>
      %c0_85 = arith.constant 0 : index
      %c0_86 = arith.constant 0 : index
      %192 = vector.load %arg18[%c0_85, %c0_86] : memref<32x16xbf16, #tpu.memory_space<vmem>>, vector<32x16xbf16>
      %193 = arith.truncf %191 : vector<2x32xf32> to vector<2x32xbf16>
      %cst_87 = arith.constant dense<0.000000e+00> : vector<2x16xf32>
      %194 = tpu.matmul %193, %192, %cst_87 {dimension_numbers = #tpu.dot_dimension_numbers<[1], [0], [0], [1], [0, 0, 1, 1], [], []>} : vector<2x32xbf16>, vector<32x16xbf16>, vector<2x16xf32> -> vector<2x16xf32>
      %c0_88 = arith.constant 0 : index
      %c0_89 = arith.constant 0 : index
      %195 = vector.load %arg19[%c0_88, %c0_89] : memref<1x16xf32, #tpu.memory_space<vmem>>, vector<1x16xf32>
      %196 = vector.broadcast %195 : vector<1x16xf32> to vector<2x16xf32>
      %197 = arith.addf %194, %196 : vector<2x16xf32>
      %c0_90 = arith.constant 0 : index
      %c0_91 = arith.constant 0 : index
      %198 = vector.load %arg20[%c0_90, %c0_91] : memref<16x128xbf16, #tpu.memory_space<vmem>>, vector<16x128xbf16>
      %199 = arith.truncf %197 : vector<2x16xf32> to vector<2x16xbf16>
      %cst_92 = arith.constant dense<0.000000e+00> : vector<2x128xf32>
      %200 = tpu.matmul %199, %198, %cst_92 {dimension_numbers = #tpu.dot_dimension_numbers<[1], [0], [0], [1], [0, 0, 1, 1], [], []>} : vector<2x16xbf16>, vector<16x128xbf16>, vector<2x128xf32> -> vector<2x128xf32>
      %c0_93 = arith.constant 0 : index
      %c0_94 = arith.constant 0 : index
      %201 = vector.load %arg21[%c0_93, %c0_94] : memref<1x128xf32, #tpu.memory_space<vmem>>, vector<1x128xf32>
      %202 = vector.broadcast %201 : vector<1x128xf32> to vector<2x128xf32>
      %203 = arith.addf %200, %202 : vector<2x128xf32>
      %c0_95 = arith.constant 0 : index
      %c0_96 = arith.constant 0 : index
      %204 = vector.load %arg24[%c0_95, %c0_96] : memref<2x128xf32, #tpu.memory_space<vmem>>, vector<2x128xf32>
      tpu.vector_store %arg24[%c0_95, %c0_96], %203 {strides = array<i32>} : memref<2x128xf32, #tpu.memory_space<vmem>>, vector<2x128xf32>,
    } else {
    }
    return
  }
  func.func @transform_0(%arg0: i32, %arg1: i32) -> (i32, i32) {
    %c0_i32 = arith.constant 0 : i32
    %c0_i32_0 = arith.constant 0 : i32
    return %arg0, %c0_i32 : i32, i32
  }
  func.func @transform_1(%arg0: i32, %arg1: i32) -> (i32, i32, i32) {
    %c0_i32 = arith.constant 0 : i32
    %c0_i32_0 = arith.constant 0 : i32
    %c0_i32_1 = arith.constant 0 : i32
    return %arg0, %c0_i32, %c0_i32_0 : i32, i32, i32
  }
  func.func @transform_2(%arg0: i32, %arg1: i32) -> (i32, i32) {
    %c0_i32 = arith.constant 0 : i32
    %c0_i32_0 = arith.constant 0 : i32
    %c0_i32_1 = arith.constant 0 : i32
    return %c0_i32, %c0_i32_0 : i32, i32
  }
  func.func @transform_3(%arg0: i32, %arg1: i32) -> (i32, i32) {
    %c0_i32 = arith.constant 0 : i32
    %c0_i32_0 = arith.constant 0 : i32
    %c0_i32_1 = arith.constant 0 : i32
    return %c0_i32, %c0_i32_0 : i32, i32
  }
  func.func @transform_4(%arg0: i32, %arg1: i32) -> (i32, i32, i32) {
    %c0_i32 = arith.constant 0 : i32
    %c0_i32_0 = arith.constant 0 : i32
    %c0_i32_1 = arith.constant 0 : i32
    return %arg1, %c0_i32, %c0_i32_0 : i32, i32, i32
  }
  func.func @transform_5(%arg0: i32, %arg1: i32) -> (i32, i32, i32) {
    %c0_i32 = arith.constant 0 : i32
    %c0_i32_0 = arith.constant 0 : i32
    %c0_i32_1 = arith.constant 0 : i32
    return %arg1, %c0_i32, %c0_i32_0 : i32, i32, i32
  }
  func.func @transform_6(%arg0: i32, %arg1: i32) -> (i32, i32, i32) {
    %c0_i32 = arith.constant 0 : i32
    %c0_i32_0 = arith.constant 0 : i32
    %c0_i32_1 = arith.constant 0 : i32
    return %arg1, %c0_i32, %c0_i32_0 : i32, i32, i32
  }
  func.func @transform_7(%arg0: i32, %arg1: i32) -> (i32, i32, i32) {
    %c0_i32 = arith.constant 0 : i32
    %c0_i32_0 = arith.constant 0 : i32
    %c0_i32_1 = arith.constant 0 : i32
    return %arg1, %c0_i32, %c0_i32_0 : i32, i32, i32
  }
  func.func @transform_8(%arg0: i32, %arg1: i32) -> (i32, i32, i32) {
    %c0_i32 = arith.constant 0 : i32
    %c0_i32_0 = arith.constant 0 : i32
    %c0_i32_1 = arith.constant 0 : i32
    return %arg1, %c0_i32, %c0_i32_0 : i32, i32, i32
  }
  func.func @transform_9(%arg0: i32, %arg1: i32) -> (i32, i32, i32) {
    %c0_i32 = arith.constant 0 : i32
    %c0_i32_0 = arith.constant 0 : i32
    %c0_i32_1 = arith.constant 0 : i32
    return %arg1, %c0_i32, %c0_i32_0 : i32, i32, i32
  }
  func.func @transform_10(%arg0: i32, %arg1: i32) -> (i32, i32, i32) {
    %c0_i32 = arith.constant 0 : i32
    %c0_i32_0 = arith.constant 0 : i32
    %c0_i32_1 = arith.constant 0 : i32
    return %arg1, %c0_i32, %c0_i32_0 : i32, i32, i32
  }
  func.func @transform_11(%arg0: i32, %arg1: i32) -> (i32, i32, i32) {
    %c0_i32 = arith.constant 0 : i32
    %c0_i32_0 = arith.constant 0 : i32
    %c0_i32_1 = arith.constant 0 : i32
    return %arg1, %c0_i32, %c0_i32_0 : i32, i32, i32
  }
  func.func @transform_12(%arg0: i32, %arg1: i32) -> (i32, i32, i32) {
    %c0_i32 = arith.constant 0 : i32
    %c0_i32_0 = arith.constant 0 : i32
    %c0_i32_1 = arith.constant 0 : i32
    return %arg1, %c0_i32, %c0_i32_0 : i32, i32, i32
  }
  func.func @transform_13(%arg0: i32, %arg1: i32) -> (i32, i32, i32) {
    %c0_i32 = arith.constant 0 : i32
    %c0_i32_0 = arith.constant 0 : i32
    %c0_i32_1 = arith.constant 0 : i32
    return %arg1, %c0_i32, %c0_i32_0 : i32, i32, i32
  }
  func.func @transform_14(%arg0: i32, %arg1: i32) -> (i32, i32, i32) {
    %c0_i32 = arith.constant 0 : i32
    %c0_i32_0 = arith.constant 0 : i32
    %c0_i32_1 = arith.constant 0 : i32
    return %arg1, %c0_i32, %c0_i32_0 : i32, i32, i32
  }
  func.func @transform_15(%arg0: i32, %arg1: i32) -> (i32, i32, i32) {
    %c0_i32 = arith.constant 0 : i32
    %c0_i32_0 = arith.constant 0 : i32
    %c0_i32_1 = arith.constant 0 : i32
    return %arg1, %c0_i32, %c0_i32_0 : i32, i32, i32
  }
  func.func @transform_16(%arg0: i32, %arg1: i32) -> (i32, i32) {
    %c0_i32 = arith.constant 0 : i32
    %c0_i32_0 = arith.constant 0 : i32
    %c0_i32_1 = arith.constant 0 : i32
    return %c0_i32, %c0_i32_0 : i32, i32
  }
  func.func @transform_17(%arg0: i32, %arg1: i32) -> (i32, i32) {
    %c0_i32 = arith.constant 0 : i32
    %c0_i32_0 = arith.constant 0 : i32
    %c0_i32_1 = arith.constant 0 : i32
    return %c0_i32, %c0_i32_0 : i32, i32
  }
  func.func @transform_18(%arg0: i32, %arg1: i32) -> (i32, i32) {
    %c0_i32 = arith.constant 0 : i32
    %c0_i32_0 = arith.constant 0 : i32
    %c0_i32_1 = arith.constant 0 : i32
    return %c0_i32, %c0_i32_0 : i32, i32
  }
  func.func @transform_19(%arg0: i32, %arg1: i32) -> (i32, i32) {
    %c0_i32 = arith.constant 0 : i32
    %c0_i32_0 = arith.constant 0 : i32
    %c0_i32_1 = arith.constant 0 : i32
    return %c0_i32, %c0_i32_0 : i32, i32
  }
  func.func @transform_20(%arg0: i32, %arg1: i32) -> (i32, i32, i32) {
    %c0_i32 = arith.constant 0 : i32
    %c0_i32_0 = arith.constant 0 : i32
    %c0_i32_1 = arith.constant 0 : i32
    return %arg0, %c0_i32, %c0_i32_0 : i32, i32, i32
  }
  func.func @transform_21(%arg0: i32, %arg1: i32) -> (i32, i32, i32, i32) {
    %c0_i32 = arith.constant 0 : i32
    %c0_i32_0 = arith.constant 0 : i32
    %c0_i32_1 = arith.constant 0 : i32
    return %arg1, %arg0, %c0_i32, %c0_i32_0 : i32, i32, i32, i32
  }
  func.func @transform_22(%arg0: i32, %arg1: i32) -> (i32, i32) {
    %c0_i32 = arith.constant 0 : i32
    %c0_i32_0 = arith.constant 0 : i32
    return %arg0, %c0_i32 : i32, i32
  }
}

</mosaic_0001>

<bundles_post_ra>
// kernel: bert_model_classifier_forward.1
= control target key start
LH: loop header
LB: loop body
LE: loop exit
PB: predicated region body
PF: predicated region fallthrough
CT: control target
= control target key end

     0   :  { %s3717_s0 = inlined_call_operand.vmem [shape: f32[16,32], index: 0, kind: input, shape index: {}]   ;;  %s3718_s1 = inlined_call_operand.vmem [shape: f32[1,16,16], index: 1, kind: input, shape index: {}]   ;;  %s3719_s2 = inlined_call_operand.vmem [shape: f32[1,32], index: 2, kind: input, shape index: {}]   ;;  %s3720_s3 = inlined_call_operand.vmem [shape: f32[1,32], index: 3, kind: input, shape index: {}]   ;;  %s3721_s4 = inlined_call_operand.vmem [shape: bf16[2,32,96], index: 4, kind: input, shape index: {}]   ;;  %s3722_s5 = inlined_call_operand.vmem [shape: f32[2,1,96], index: 5, kind: input, shape index: {}]   ;;  %s3723_s6 = inlined_call_operand.vmem [shape: bf16[2,32,32], index: 6, kind: input, shape index: {}]   ;;  %s3724_s7 = inlined_call_operand.vmem [shape: f32[2,1,32], index: 7, kind: input, shape index: {}]   ;;  %s3725_s8 = inlined_call_operand.vmem [shape: f32[2,1,32], index: 8, kind: input, shape index: {}]   ;;  %s3726_s9 = inlined_call_operand.vmem [shape: f32[2,1,32], index: 9, kind: input, shape index: {}]   ;;  %s3727_s10 = inlined_call_operand.vmem [shape: bf16[2,32,64], index: 10, kind: input, shape index: {}]   ;;  %s3728_s11 = inlined_call_operand.vmem [shape: f32[2,1,64], index: 11, kind: input, shape index: {}]   ;;  %s3729_s12 = inlined_call_operand.vmem [shape: bf16[2,64,32], index: 12, kind: input, shape index: {}]   ;;  %s3730_s13 = inlined_call_operand.vmem [shape: f32[2,1,32], index: 13, kind: input, shape index: {}]   ;;  %s3731_s14 = inlined_call_operand.vmem [shape: f32[2,1,32], index: 14, kind: input, shape index: {}]   ;;  %s3732_s15 = inlined_call_operand.vmem [shape: f32[2,1,32], index: 15, kind: input, shape index: {}]   ;;  %s3733_s16 = inlined_call_operand.vmem [shape: bf16[32,16], index: 16, kind: input, shape index: {}]   ;;  %s3734_s17 = inlined_call_operand.vmem [shape: f32[1,16], index: 17, kind: input, shape index: {}]   ;;  %s3735_s18 = inlined_call_operand.vmem [shape: bf16[16,128], index: 18, kind: input, shape index: {}]   ;;  %s3736_s19 = inlined_call_operand.vmem [shape: f32[1,128], index: 19, kind: input, shape index: {}]   ;;  %s3737_s20 = inlined_call_operand.hbm [shape: f32[1,16,32], index: 20, kind: output, shape index: {0}]   ;;  %s3738_s21 = inlined_call_operand.vmem [shape: f32[2,1,16,32], index: 21, kind: output, shape index: {1}]   ;;  %s3739_s22 = inlined_call_operand.hbm [shape: f32[2,128], index: 22, kind: output, shape index: {2}]  }
   0x1   :  { %3747 = sst [smem:[#allocation12_spill]] %s3717_s0 }
   0x2   :  { %3748 = sst [smem:[#allocation13_spill]] %s3718_s1 }
   0x3   :  { %3749 = sst [smem:[#allocation14_spill]] %s3719_s2 }
   0x4   :  { %3750 = sst [smem:[#allocation15_spill]] %s3720_s3 }
   0x5   :  { %3751 = sst [smem:[#allocation16_spill]] %s3721_s4 }
   0x6   :  { %3752 = sst [smem:[#allocation17_spill]] %s3722_s5 }
   0x7   :  { %3753 = sst [smem:[#allocation18_spill]] %s3723_s6 }
   0x8   :  { %3754 = sst [smem:[#allocation19_spill]] %s3727_s10 }
   0x9   :  { %3755 = sst [smem:[#allocation20_spill]] %s3733_s16 }
   0xa   :  { %3756 = sst [smem:[#allocation21_spill]] %s3734_s17 }
   0xb   :  { %3757 = sst [smem:[#allocation22_spill]] %s3735_s18 }
   0xc   :  { %3758 = sst [smem:[#allocation23_spill]] %s3736_s19 }
   0xd   :  { %3759 = sst [smem:[#allocation24_spill]] %s3737_s20 }
   0xe   :  { %3760 = sst [smem:[#allocation25_spill]] %s3739_s22 }
   0xf   :  { %28 = vsyncpa [#allocation4], 0 }
  0x10   :  { %29 = vsyncpa [#allocation6], 0  ;;  %s3330_s3 = smov 0   ;;  %s3332_s28 = smov 0  }
  0x11   :  { %s3334_s29 = smov 0  }
  0x12 LB: > { %3761 = sst [smem:[#allocation9_spill]] %s3188_s28  ;;  %s44_s4 = sadd.s32 1, %s3188_s28  ;;  %s3192_s29 = sphi %s3334_s29, %s35_s29   ;;  %s3188_s28 = sphi %s3332_s28, %s3793_s28   ;;  %s3184_s3 = sphi %s3330_s3, %s3792_s3  }
  0x13   : > { %3762 = sst [smem:[#allocation10_spill]] %s3192_s29  ;;  %p45_p0 = scmp.ge.s32.totalorder %s44_s4, 2 }
  0x14   : > { %p2661_p1 = scmp.ge.s32.totalorder %s3192_s29, 1  ;;  %p748_p2 = scmp.lt.s32.totalorder %s3192_s29, 3 }
  0x15   : > { %s3795_s4 = smov (%p45_p0, %s44_s4), 0 }
  0x16   : > { %3763 = sst [smem:[#allocation11_spill]] %s3795_s4  ;;  %p749_p3 = pnand %p2661_p1, %p748_p2 }
  0x17   : > { %p874_p4 = scmp.lt.s32.totalorder (!%p749_p3), %s3184_s3, 1  ;;  %s3765_s2 = sld [smem:[#allocation16_spill]] (!%p749_p3) }
  0x18   : > { %752 = sbr.rel (%p749_p3) target bundleno = 3984 (0xf90), region = 100  ;;  %s3766_s28 = sld [smem:[#allocation18_spill]] (!%p749_p3) }
  0x19   : > { %s3767_s10 = sld [smem:[#allocation19_spill]] (!%p749_p3)  ;;  %p2672_p5 = scmp.ne.s32.totalorder (!%p749_p3), %s3184_s3, 0 }
  0x1f   : > { %s3353_s0 = scalar_select %p874_p4, %s3184_s3, 1 }
  0x20   : > { %931 = sbr.rel (%p2672_p5) target bundleno = 357 (0x165), region = 104  ;;  %s3768_s29 = sld [smem:[#allocation12_spill]] (!%p2672_p5)  ;;  %vm936_vm0 = vcmask (!%p2672_p5), 261120  }
  0x21   : > { %s2735_s23 = sshll.u32 %s3353_s0, 4  ;;  %s2738_s6 = sshll.u32 %s3353_s0, 5 }
  0x22   : > { %s3363_s27 = scalar_lea.vmem %s3765_s2, %s2735_s23  ;;  %s3368_s22 = scalar_lea.vmem %s3766_s28, %s2735_s23 }
  0x23   : > { %s3385_s2 = scalar_lea.vmem %s3767_s10, %s2735_s23  ;;  %s3395_s19 = scalar_lea.vmem %s3729_s12, %s2738_s6 }
  0x24   : > { %s911_s1 = scalar_lea.vmem %s3730_s13, %s3353_s0  ;;  %s914_s25 = scalar_lea.vmem %s3731_s14, %s3353_s0 }
  0x25   : > { %s917_s10 = scalar_lea.vmem %s3732_s15, %s3353_s0  ;;  %s3412_s4 = scalar_lea.vmem %s3738_s21, %s2735_s23 }
  0x26   : > { %s3769_s17 = smov (!%p2672_p5), %s3768_s29  ;;  %v932_v0 = vld [vmem:[%s3768_s29] sm:$0xff] (!%p2672_p5)  ;;  %s3770_s5 = sld [smem:[#allocation14_spill]] (!%p2672_p5) }
  0x27   : > { %v933_v1 = vld [vmem:[%s3769_s17 + $0x8] sm:$0xff]  ;;  %v937_v2 = vsel %vm936_vm0, %v932_v0, 0.0  ;;  %s3771_s28 = sld [smem:[#allocation15_spill]] }
  0x28   : > { %938 = vadd.xlane.f32.xlu0 %v937_v2  ;;  %v940_v3 = vsel %vm936_vm0, %v933_v1, 0.0 }
  0x2c   : > { %941 = vadd.xlane.f32.xlu0 %v940_v3  ;;  %v2673_v21 = vld [vmem:[%s3770_s5] ss:$0 sm:$0xff] }
  0x2d   : > { %v2674_v23 = vld [vmem:[%s3771_s28] ss:$0 sm:$0xff] }
  0xb5   : > { %v939_v4 = vpop.xlane.xlu0 %938 }
  0xb6   : > { %v944_v5 = vmul.f32 0.03125, %v939_v4 }
  0xb8   : > { %v946_v6 = vsub.f32 %v932_v0, %v944_v5 }
  0xb9   : > { %v942_v7 = vpop.xlane.xlu0 %941 }
  0xba   : > { %v945_v8 = vmul.f32 0.03125, %v942_v7  ;;  %v948_v9 = vmul.f32 %v946_v6, %v946_v6 }
  0xbc   : > { %v947_v10 = vsub.f32 %v933_v1, %v945_v8  ;;  %v950_v11 = vsel %vm936_vm0, %v948_v9, 0.0 }
  0xbd   : > { %951 = vadd.xlane.f32.xlu1 %v950_v11 }
  0xbe   : > { %v949_v12 = vmul.f32 %v947_v10, %v947_v10 }
  0xc0   : > { %v953_v13 = vsel %vm936_vm0, %v949_v12, 0.0 }
  0xc1   : > { %954 = vadd.xlane.f32.xlu1 %v953_v13 }
 0x14a   : > { %v952_v14 = vpop.xlane.xlu1 %951 }
 0x14b   : > { %v956_v15 = vmul.f32 0.03125, %v952_v14 }
 0x14d   : > { %v958_v16 = vadd.f32 1e-12, %v956_v15 }
 0x14e   : > { %v955_v17 = vpop.xlane.xlu1 %954 }
 0x14f   : > { %2994 = vrsqrt.f32 %v958_v16  ;;  %v957_v18 = vmul.f32 0.03125, %v955_v17 }
 0x151   : > { %v959_v19 = vadd.f32 1e-12, %v957_v18 }
 0x153   : > { %2996 = vrsqrt.f32 %v959_v19 }
 0x159   : > { %v2995_v20 = vpop.eup %2994 }
 0x15a   : > { %v962_v22 = vmul.f32 %v2995_v20, %v946_v6 }
 0x15c   : > { %v970_v24 = vmul.f32 %v2673_v21, %v962_v22 }
 0x15d   : > { %v2997_v25 = vpop.eup %2996 }
 0x15e   : > { %v978_v26 = vadd.f32 %v2674_v23, %v970_v24  ;;  %v963_v27 = vmul.f32 %v2997_v25, %v947_v10 }
 0x160   : > { %980 = vst.msk [vmem:[#allocation2] sm:$0xff] %vm936_vm0, %v978_v26  ;;  %982 = vst.msk [vmem:[#allocation3] sm:$0xff] %vm936_vm0, %v978_v26  ;;  %v971_v28 = vmul.f32 %v2673_v21, %v963_v27 }
 0x162   : > { %v979_v29 = vadd.f32 %v2674_v23, %v971_v28 }
 0x164   : > { %981 = vst.msk [vmem:[#allocation2 + $0x8] sm:$0xff] %vm936_vm0, %v979_v29  ;;  %983 = vst.msk [vmem:[#allocation3 + $0x8] sm:$0xff] %vm936_vm0, %v979_v29 }
 0x165 PF: > { %v3053_v30 = vld [vmem:[%s3363_s27] sm:$0xff]   ;;  %v3194_v31 = vmov 0.0   ;;  %v3054_v32 = vld [vmem:[%s3363_s27 + $0x8] sm:$0xff]   ;;  %vm3195_vm1 = vmmov 0   ;;  %vm1010_vm2 = vcmask 261120   ;;  %s3772_s27 = sld [smem:[#allocation17_spill]] }
 0x166   : > { %2791 = vmatprep.subr.bf16.mxu1 %v3194_v31  ;;  %2795 = vmatprep.mubr.msk.bf16.mxu1 %vm3195_vm1, %v3194_v31  ;;  %vm1063_vm3 = vcmask 64512   ;;  %s3196_s18 = smov 120   ;;  %s3197_s24 = smov 80   ;;  %vm1151_vm5 = vcmask 130048   ;;  %vm1901_vm6 = vcmask 195584   ;;  %vm2145_vm7 = vcmask 523264  }
 0x167   : > { %2792 = vmatpush3.bf16.msra.mxu1 %v3053_v30  ;;  %v3440_v33 = vld [vmem:[#allocation2] sm:$0xff]  ;;  %s3198_s16 = smov 96   ;;  %s3199_s23 = smov 112   ;;  %vm3473_vm4 = vmpackc.low %vm1063_vm3, %vm1063_vm3 }
 0x168   : > { %2793 = vmatprep.subr.bf16.mxu1 %v3194_v31  ;;  %s3200_s5 = smov 88   ;;  %s3776_s28 = sld [smem:[#allocation13_spill]] }
 0x169   : > { %s3207_s26 = smov 16   ;;  %s3208_s30 = smov 40  }
 0x16a   : > { %p2721_p6 = scmp.ne.s32.totalorder %s3184_s3, 1 }
 0x16b   : > { %v3442_v34 = vld [vmem:[#allocation2 + $0x8] sm:$0xff]  ;;  %2794 = vmatpush3.bf16.msra.mxu1 %v3054_v32  ;;  %s3773_s29 = scalar_lea.vmem %s3772_s27, %s3353_s0  ;;  %s3778_s27 = scalar_lea.vmem %s3724_s7, %s3353_s0  ;;  %vm3211_vm8 = vmmov (!%p2721_p6), 0   ;;  %vm2247_vm9 = vcmask (!%p2721_p6), 1040384  }
 0x16c   : > { %v990_v35 = vpack.c.bf16 %v3442_v34, %v3440_v33  ;;  %v2675_v36 = vld [vmem:[%s3773_s29] ss:$0 sm:$0xff]  ;;  %s3201_s29 = smov 56  }
 0x16e   : > { %2796 = vmatmul.mubr.msk.bf16.vlgmr.msra.gmra.mrb[0].mxu1 %vm1010_vm2, %v990_v35  ;;  %s3777_s6 = smov %s3776_s28  ;;  %v3497_v62 = vld [vmem:[%s3776_s28 + $0x8] sm:$0xff]  ;;  %s3209_s28 = smov 24  }
 0x16f   : > { %v3502_v1 = vld [vmem:[%s3777_s6] sm:$0xff] }
 0x241   : > { %v1048_v37 = vpop.f32.mrb[0].mxu1 }
 0x242   : > { %v3453_v38 = vadd.f32 %v2675_v36, %v1048_v37  ;;  %v2797_v39 = vpop.f32.mrb[1].mxu1 }
 0x243   : > { %v1051_v40 = vpop.f32.mrb[2].mxu1 }
 0x244   : > { %v3455_v41 = vadd.f32 %v2675_v36, %v1051_v40  ;;  %1261 = vrot.lane.b32.xlu1 %v3453_v38, %s3196_s18  ;;  %v2798_v42 = vpop.f32.mrb[3].mxu1  ;;  %2803 = vmatprep.mubr.msk.f32.mxu1 %vm1063_vm3, %v3453_v38 }
 0x246   : > { %v3462_v43 = vpack.i.bf16 %v3455_v41, %v3453_v38 }
 0x248   : > { %3009 = vrot.lane.b32.xlu1 %v3462_v43, %s3197_s24  ;;  %2999 = vrot.lane.b32.xlu0 %v3462_v43, %s3198_s16  ;;  %s3203_s24 = smov 48   ;;  %s3204_s16 = smov 72  }
 0x24c   : > { %1465 = vrot.lane.b32.xlu1 %v3453_v38, %s3199_s23  ;;  %3004 = vrot.lane.b32.xlu0 %v3462_v43, %s3200_s5  ;;  %s3206_s5 = smov 8  }
 0x250   : > { %1263 = vrot.lane.b32.xlu0 %v3455_v41, %s3196_s18  ;;  %s3202_s18 = smov 64  }
 0x254   : > { %1467 = vrot.lane.b32.xlu0 %v3455_v41, %s3199_s23  ;;  %s3205_s23 = smov 104  }
 0x2b6   : > { %v1262_v44 = vpop.permute.xlu1 %1261 }
 0x2b7   : > { %2817 = vmatprep.mubr.msk.f32.mxu0 %vm1063_vm3, %v1262_v44 }
 0x2ba   : > { %v3000_v45 = vpop.permute.xlu0 %2999  ;;  %v3010_v48 = vpop.permute.xlu1 %3009 }
 0x2bb   : > { %v3002_v46 = vunpack.i.h.bf16 %v3000_v45  ;;  %v3001_v47 = vunpack.i.l.bf16 %v3000_v45  ;;  %v3012_v52 = vunpack.i.h.bf16 %v3010_v48  ;;  %v3011_v53 = vunpack.i.l.bf16 %v3010_v48 }
 0x2bd   : > { %v2897_v50 = vpack.c.bf16 %v3002_v46, %v3001_v47  ;;  %v2917_v57 = vpack.c.bf16 %v3012_v52, %v3011_v53 }
 0x2be   : > { %v3005_v51 = vpop.permute.xlu0 %3004  ;;  %v1466_v59 = vpop.permute.xlu1 %1465 }
 0x2bf   : > { %v3007_v54 = vunpack.i.h.bf16 %v3005_v51  ;;  %v3006_v55 = vunpack.i.l.bf16 %v3005_v51  ;;  %2899 = vmatprep.subr.msk.bf16.mxu1 %vm3473_vm4, %v2897_v50 }
 0x2c0   : > { %2902 = vmatpush3.bf16.xpose.msk.msra.mxu1 %vm3473_vm4, %v2897_v50 }
 0x2c1   : > { %v2907_v56 = vpack.c.bf16 %v3007_v54, %v3006_v55 }
 0x2c2   : > { %v1264_v58 = vpop.permute.xlu0 %1263 }
 0x2c3   : > { %2909 = vmatprep.subr.msk.bf16.mxu0 %vm3473_vm4, %v2907_v56 }
 0x2c4   : > { %2912 = vmatpush3.bf16.xpose.msk.msra.mxu0 %vm3473_vm4, %v2907_v56 }
 0x2c5   : > { %2919 = vmatprep.subr.msk.bf16.mxu0 %vm3473_vm4, %v2917_v57 }
 0x2c6   : > { %v1468_v60 = vpop.permute.xlu0 %1467 }
 0x2c7   : > { %2804 = vmatmul.mubr.msk.f32.vlgmr.msra.gmra.mrb[4].mxu1 %vm1063_vm3, %v3455_v41 }
 0x2cb   : > { %2818 = vmatmul.mubr.msk.f32.vlgmr.msra.gmra.mrb[0].mxu0 %vm1063_vm3, %v1264_v58 }
 0x2cc   : > { %2922 = vmatpush3.bf16.xpose.msk.msra.mxu0 %vm3473_vm4, %v2917_v57  ;;  %2831 = vmatprep.mubr.msk.f32.mxu0 %vm1063_vm3, %v1466_v59 }
 0x2d3   : > { %2832 = vmatmul.mubr.msk.f32.vlgmr.msra.gmra.mrb[2].mxu0 %vm1063_vm3, %v1468_v60 }
 0x39a   : > { %v2805_v61 = vpop.f32.mrb[4].mxu1 }
 0x39b   : > { %v1148_v63 = vmul.f32 0.35355338, %v2805_v61  ;;  %v1138_v0 = vpop.f32.mrb[5].mxu1 }
 0x39c   : > { %v1147_v2 = vmul.f32 0.35355338, %v1138_v0 }
 0x39d   : > { %v1150_v3 = vadd.f32 %v1148_v63, %v3497_v62 }
 0x39e   : > { %v2819_v4 = vpop.f32.mrb[0].mxu0  ;;  %v1149_v5 = vadd.f32 %v1147_v2, %v3502_v1 }
 0x39f   : > { %v1353_v6 = vmul.f32 0.35355338, %v2819_v4  ;;  %v1343_v7 = vpop.f32.mrb[1].mxu0  ;;  %v1155_v8 = vsel %vm1151_vm5, %v1150_v3, -inf }
 0x3a0   : > { %v1352_v9 = vmul.f32 0.35355338, %v1343_v7  ;;  %1156 = vmax.xlane.f32.xlu0 %v1155_v8  ;;  %v1152_v10 = vsel %vm1151_vm5, %v1149_v5, -inf }
 0x3a1   : > { %1153 = vmax.xlane.f32.xlu1 %v1152_v10  ;;  %v1355_v11 = vadd.f32 %v1353_v6, %v3497_v62 }
 0x3a2   : > { %v1354_v12 = vadd.f32 %v1352_v9, %v3502_v1 }
 0x3a3   : > { %v1359_v13 = vsel %vm1151_vm5, %v1355_v11, -inf }
 0x3a4   : > { %v1356_v14 = vsel %vm1151_vm5, %v1354_v12, -inf }
 0x3a5   : > { %1357 = vmax.xlane.f32.xlu0 %v1356_v14  ;;  %1360 = vmax.xlane.f32.xlu1 %v1359_v13 }
 0x3a6   : > { %v2833_v15 = vpop.f32.mrb[2].mxu0 }
 0x3a7   : > { %v1557_v16 = vmul.f32 0.35355338, %v2833_v15  ;;  %v1547_v17 = vpop.f32.mrb[3].mxu0 }
 0x3a8   : > { %v1556_v18 = vmul.f32 0.35355338, %v1547_v17 }
 0x3a9   : > { %v3513_v19 = vadd.f32 %v1557_v16, %v3497_v62 }
 0x3aa   : > { %v1558_v20 = vadd.f32 %v1556_v18, %v3502_v1 }
 0x3ab   : > { %v1563_v21 = vsel %vm1151_vm5, %v3513_v19, -inf }
 0x3ac   : > { %1564 = vmax.xlane.f32.xlu1 %v1563_v21  ;;  %v1560_v22 = vsel %vm1151_vm5, %v1558_v20, -inf }
 0x3ad   : > { %1561 = vmax.xlane.f32.xlu0 %v1560_v22 }
 0x3bd   : > { %3019 = vrot.lane.b32.xlu1 %v3462_v43, %s3201_s29 }
 0x3c3   : > { %3014 = vrot.lane.b32.xlu0 %v3462_v43, %s3202_s18 }
 0x42d   : > { %v1157_v23 = vpop.xlane.xlu0 %1156 }
 0x42e   : > { %v1159_v24 = vsub.f32 %v1150_v3, %v1157_v23  ;;  %v1154_v25 = vpop.xlane.xlu1 %1153 }
 0x42f   : > { %v1158_v26 = vsub.f32 %v1149_v5, %v1154_v25 }
 0x430   : > { %v1162_v27 = vmul.f32 1.442695, %v1159_v24 }
 0x431   : > { %v1160_v28 = vmul.f32 1.442695, %v1158_v26 }
 0x432   : > { %3063 = vpow2.f32 %v1162_v27  ;;  %v1358_v29 = vpop.xlane.xlu0 %1357  ;;  %v1361_v30 = vpop.xlane.xlu1 %1360 }
 0x433   : > { %3065 = vpow2.f32 %v1160_v28  ;;  %v1362_v32 = vsub.f32 %v1354_v12, %v1358_v29  ;;  %v1363_v35 = vsub.f32 %v1355_v11, %v1361_v30 }
 0x435   : > { %v1364_v36 = vmul.f32 1.442695, %v1362_v32  ;;  %v1366_v37 = vmul.f32 1.442695, %v1363_v35 }
 0x437   : > { %3067 = vpow2.f32 %v1364_v36 }
 0x438   : > { %3069 = vpow2.f32 %v1366_v37 }
 0x439   : > { %v1565_v39 = vpop.xlane.xlu1 %1564 }
 0x43a   : > { %v1562_v40 = vpop.xlane.xlu0 %1561  ;;  %v1567_v2 = vsub.f32 %v3513_v19, %v1565_v39 }
 0x43b   : > { %v1566_v42 = vsub.f32 %v1558_v20, %v1562_v40 }
 0x43c   : > { %v3064_v44 = vpop.eup %3063  ;;  %v1570_v3 = vmul.f32 1.442695, %v1567_v2 }
 0x43d   : > { %v3066_v45 = vpop.eup %3065  ;;  %v1568_v46 = vmul.f32 1.442695, %v1566_v42  ;;  %v3020_v47 = vpop.permute.xlu1 %3019  ;;  %v1167_v48 = vsel %vm1151_vm5, %v3064_v44, 0.0 }
 0x43e   : > { %v3022_v50 = vunpack.i.h.bf16 %v3020_v47  ;;  %v3015_v51 = vpop.permute.xlu0 %3014  ;;  %1168 = vadd.xlane.f32.xlu1 %v1167_v48  ;;  %v1164_v52 = vsel %vm1151_vm5, %v3066_v45, 0.0  ;;  %v3021_v53 = vunpack.i.l.bf16 %v3020_v47 }
 0x43f   : > { %3071 = vpow2.f32 %v1568_v46  ;;  %v3017_v54 = vunpack.i.h.bf16 %v3015_v51  ;;  %v3016_v55 = vunpack.i.l.bf16 %v3015_v51  ;;  %1165 = vadd.xlane.f32.xlu0 %v1164_v52 }
 0x440   : > { %v2913_v60 = vpack.c.bf16 %v3022_v50, %v3021_v53  ;;  %3073 = vpow2.f32 %v1570_v3 }
 0x441   : > { %v3068_v56 = vpop.eup %3067  ;;  %v2903_v57 = vpack.c.bf16 %v3017_v54, %v3016_v55 }
 0x442   : > { %v3070_v58 = vpop.eup %3069  ;;  %v1368_v59 = vsel %vm1151_vm5, %v3068_v56, 0.0 }
 0x443   : > { %2904 = vmatprep.subr.bf16.mxu1 %v2903_v57  ;;  %1369 = vadd.xlane.f32.xlu0 %v1368_v59  ;;  %v1371_v61 = vsel %vm1151_vm5, %v3070_v58, 0.0 }
 0x444   : > { %1372 = vadd.xlane.f32.xlu1 %v1371_v61  ;;  %2906 = vmatpush3.bf16.msra.mxu1 %v2903_v57 }
 0x445   : > { %2914 = vmatprep.subr.bf16.mxu1 %v2913_v60 }
 0x449   : > { %v3072_v63 = vpop.eup %3071 }
 0x44a   : > { %v1572_v0 = vsel %vm1151_vm5, %v3072_v63, 0.0  ;;  %v3074_v4 = vpop.eup %3073 }
 0x44b   : > { %1573 = vadd.xlane.f32.xlu0 %v1572_v0  ;;  %v1575_v5 = vsel %vm1151_vm5, %v3074_v4, 0.0 }
 0x455   : > { %3024 = vrot.lane.b32.xlu1 %v3462_v43, %s3203_s24  ;;  %s3779_s24 = scalar_lea.vmem %s3725_s8, %s3353_s0 }
 0x461   : > { %3029 = vrot.lane.b32.xlu0 %v3462_v43, %s3204_s16 }
 0x465   : > { %1671 = vrot.lane.b32.xlu0 %v3455_v41, %s3205_s23 }
 0x479   : > { %1576 = vadd.xlane.f32.xlu1 %v1575_v5 }
 0x48a   : > { %1669 = vrot.lane.b32.xlu1 %v3453_v38, %s3205_s23  ;;  %s3780_s23 = scalar_lea.vmem %s3726_s9, %s3353_s0 }
 0x4cb   : > { %v1169_v6 = vpop.xlane.xlu1 %1168 }
 0x4cc   : > { %3075 = vrcp.f32 %v1169_v6  ;;  %v1166_v7 = vpop.xlane.xlu0 %1165 }
 0x4cd   : > { %3077 = vrcp.f32 %v1166_v7 }
 0x4d0   : > { %v1370_v8 = vpop.xlane.xlu0 %1369 }
 0x4d1   : > { %3079 = vrcp.f32 %v1370_v8  ;;  %v1373_v9 = vpop.xlane.xlu1 %1372 }
 0x4d2   : > { %3081 = vrcp.f32 %v1373_v9 }
 0x4d5   : > { %v3025_v10 = vpop.permute.xlu1 %3024 }
 0x4d6   : > { %v3076_v11 = vpop.eup %3075  ;;  %v3027_v41 = vunpack.i.h.bf16 %v3025_v10  ;;  %v3026_v13 = vunpack.i.l.bf16 %v3025_v10  ;;  %v3056_v10 = vld [vmem:[%s3368_s22 + $0x8] sm:$0xff]  }
 0x4d7   : > { %v3078_v12 = vpop.eup %3077  ;;  %v1173_v16 = vmul.f32 %v3076_v11, %v3064_v44 }
 0x4d8   : > { %v1574_v14 = vpop.xlane.xlu0 %1573  ;;  %v1172_v15 = vmul.f32 %v3078_v12, %v3066_v45  ;;  %v2923_v17 = vpack.c.bf16 %v3027_v41, %v3026_v13 }
 0x4d9   : > { %3083 = vrcp.f32 %v1574_v14 }
 0x4da   : > { %2810 = vmatprep.mubr.msk.f32.mxu1 %vm1151_vm5, %v1172_v15 }
 0x4db   : > { %v3080_v38 = vpop.eup %3079  ;;  %2811 = vmatmul.mubr.msk.f32.vlgmr.msra.gmra.mrb[6].mxu1 %vm1151_vm5, %v1173_v16 }
 0x4dc   : > { %v3082_v18 = vpop.eup %3081  ;;  %2916 = vmatpush3.bf16.msra.mxu1 %v2913_v60  ;;  %v3030_v19 = vpop.permute.xlu0 %3029  ;;  %v1376_v20 = vmul.f32 %v3080_v38, %v3068_v56 }
 0x4dd   : > { %v1377_v21 = vmul.f32 %v3082_v18, %v3070_v58  ;;  %v3032_v22 = vunpack.i.h.bf16 %v3030_v19  ;;  %v3031_v23 = vunpack.i.l.bf16 %v3030_v19  ;;  %2924 = vmatprep.subr.bf16.mxu1 %v2923_v17 }
 0x4de   : > { %2824 = vmatprep.mubr.msk.f32.mxu1 %vm1151_vm5, %v1376_v20 }
 0x4df   : > { %v2927_v24 = vpack.c.bf16 %v3032_v22, %v3031_v23  ;;  %2825 = vmatmul.mubr.msk.f32.vlgmr.msra.gmra.mrb[8].mxu1 %vm1151_vm5, %v1377_v21 }
 0x4e0   : > { %2926 = vmatpush3.bf16.msra.mxu1 %v2923_v17  ;;  %v1672_v32 = vpop.permute.xlu0 %1671 }
 0x4e1   : > { %2929 = vmatprep.subr.msk.bf16.mxu1 %vm3473_vm4, %v2927_v24 }
 0x4e3   : > { %v3084_v25 = vpop.eup %3083 }
 0x4e4   : > { %v1580_v26 = vmul.f32 %v3084_v25, %v3072_v63 }
 0x4e6   : > { %2838 = vmatprep.mubr.msk.f32.mxu1 %vm1151_vm5, %v1580_v26 }
 0x506   : > { %v1577_v27 = vpop.xlane.xlu1 %1576 }
 0x507   : > { %3085 = vrcp.f32 %v1577_v27 }
 0x50a   : > { %v1670_v30 = vpop.permute.xlu1 %1669 }
 0x511   : > { %v3086_v28 = vpop.eup %3085 }
 0x512   : > { %v1581_v29 = vmul.f32 %v3086_v28, %v3074_v4  ;;  %v2703_v28 = vld [vmem:[%s3778_s27] ss:$0 sm:$0xff] }
 0x514   : > { %2839 = vmatmul.mubr.msk.f32.vlgmr.msra.gmra.mrb[10].mxu1 %vm1151_vm5, %v1581_v29 }
 0x515   : > { %2932 = vmatpush3.bf16.xpose.msk.msra.mxu1 %vm3473_vm4, %v2927_v24  ;;  %2845 = vmatprep.mubr.msk.f32.mxu1 %vm1063_vm3, %v1670_v30 }
 0x516   : > { %2863 = vmatprep.subr.bf16.mxu1 %v3194_v31 }
 0x51c   : > { %2846 = vmatmul.mubr.msk.f32.vlgmr.msra.gmra.mrb[12].mxu1 %vm1063_vm3, %v1672_v32 }
 0x51d   : > { %2867 = vmatprep.mubr.msk.bf16.mxu1 %vm3195_vm1, %v3194_v31 }
 0x5ae   : > { %v3547_v35 = vpop.f32.mrb[6].mxu1 }
 0x5af   : > { %v3549_v36 = vpop.f32.mrb[7].mxu1 }
 0x5b2   : > { %v2826_v37 = vpop.f32.mrb[8].mxu1 }
 0x5b3   : > { %v1456_v39 = vpop.f32.mrb[9].mxu1 }
 0x5b4   : > { %v3038_v40 = vpack.i.bf16 %v2826_v37, %v1456_v39 }
 0x5e7   : > { %v2840_v42 = vpop.f32.mrb[10].mxu1 }
 0x5e8   : > { %v1660_v49 = vpop.f32.mrb[11].mxu1 }
 0x5e9   : > { %v3043_v44 = vpack.i.bf16 %v2840_v42, %v1660_v49 }
 0x5ef   : > { %v2847_v45 = vpop.f32.mrb[12].mxu1 }
 0x5f0   : > { %v1761_v46 = vmul.f32 0.35355338, %v2847_v45  ;;  %v1751_v47 = vpop.f32.mrb[13].mxu1 }
 0x5f1   : > { %v1760_v48 = vmul.f32 0.35355338, %v1751_v47 }
 0x5f2   : > { %v1763_v50 = vadd.f32 %v1761_v46, %v3497_v62 }
 0x5f3   : > { %v1762_v51 = vadd.f32 %v1760_v48, %v3502_v1 }
 0x5f4   : > { %v1767_v52 = vsel %vm1151_vm5, %v1763_v50, -inf }
 0x5f5   : > { %1768 = vmax.xlane.f32.xlu0 %v1767_v52  ;;  %v1764_v53 = vsel %vm1151_vm5, %v1762_v51, -inf }
 0x5f6   : > { %1765 = vmax.xlane.f32.xlu1 %v1764_v53 }
 0x682   : > { %v1769_v54 = vpop.xlane.xlu0 %1768 }
 0x683   : > { %v1771_v55 = vsub.f32 %v1763_v50, %v1769_v54  ;;  %v1766_v56 = vpop.xlane.xlu1 %1765  ;;  %v3058_v54 = vld [vmem:[%s3385_s2 + $0x8] sm:$0xff]  }
 0x684   : > { %v1770_v57 = vsub.f32 %v1762_v51, %v1766_v56 }
 0x685   : > { %v1774_v58 = vmul.f32 1.442695, %v1771_v55 }
 0x686   : > { %v1772_v59 = vmul.f32 1.442695, %v1770_v57 }
 0x687   : > { %3087 = vpow2.f32 %v1774_v58 }
 0x688   : > { %3089 = vpow2.f32 %v1772_v59 }
 0x691   : > { %v3088_v60 = vpop.eup %3087 }
 0x692   : > { %v3090_v61 = vpop.eup %3089  ;;  %v1779_v62 = vsel %vm1151_vm5, %v3088_v60, 0.0 }
 0x693   : > { %1780 = vadd.xlane.f32.xlu1 %v1779_v62  ;;  %v1776_v1 = vsel %vm1151_vm5, %v3090_v61, 0.0  ;;  %v2707_v62 = vld [vmem:[%s3779_s24] ss:$0 sm:$0xff] }
 0x694   : > { %1777 = vadd.xlane.f32.xlu0 %v1776_v1 }
 0x6a4   : > { %3039 = vrot.lane.b32.xlu1 %v3038_v40, %s3206_s5 }
 0x6a8   : > { %3044 = vrot.lane.b32.xlu1 %v3043_v44, %s3207_s26  ;;  %s3784_s26 = sld [smem:[#allocation21_spill]] (!%p2721_p6) }
 0x6aa   : > { %3034 = vrot.lane.b32.xlu0 %v3462_v43, %s3208_s30  ;;  %v3055_v43 = vld [vmem:[%s3368_s22] sm:$0xff]  }
 0x720   : > { %v1781_v63 = vpop.xlane.xlu1 %1780 }
 0x721   : > { %3091 = vrcp.f32 %v1781_v63  ;;  %v1778_v0 = vpop.xlane.xlu0 %1777 }
 0x722   : > { %3093 = vrcp.f32 %v1778_v0 }
 0x724   : > { %v3040_v13 = vpop.permute.xlu1 %3039 }
 0x725   : > { %v3035_v2 = vpop.permute.xlu0 %3034  ;;  %v3042_v15 = vunpack.i.h.bf16 %v3040_v13  ;;  %v3041_v16 = vunpack.i.l.bf16 %v3040_v13 }
 0x726   : > { %v3037_v3 = vunpack.i.h.bf16 %v3035_v2  ;;  %v3036_v4 = vunpack.i.l.bf16 %v3035_v2 }
 0x727   : > { %v1898_v19 = vsel %vm1063_vm3, %v3547_v35, %v3042_v15  ;;  %v1897_v20 = vsel %vm1063_vm3, %v3549_v36, %v3041_v16 }
 0x728   : > { %v2933_v5 = vpack.c.bf16 %v3037_v3, %v3036_v4  ;;  %v3045_v14 = vpop.permute.xlu1 %3044  ;;  %v2708_v3 = vld [vmem:[%s3780_s23] ss:$0 sm:$0xff] }
 0x729   : > { %v3047_v38 = vunpack.i.h.bf16 %v3045_v14  ;;  %v3046_v17 = vunpack.i.l.bf16 %v3045_v14 }
 0x72a   : > { %2934 = vmatprep.subr.bf16.mxu0 %v2933_v5 }
 0x72b   : > { %v3092_v6 = vpop.eup %3091  ;;  %2936 = vmatpush3.bf16.msra.mxu0 %v2933_v5  ;;  %v1899_v23 = vsel %vm1151_vm5, %v1897_v20, %v3046_v17  ;;  %v1900_v24 = vsel %vm1151_vm5, %v1898_v19, %v3047_v38 }
 0x72c   : > { %v3094_v7 = vpop.eup %3093  ;;  %2855 = vmatprep.subr.bf16.mxu0 %v3194_v31  ;;  %v1785_v9 = vmul.f32 %v3092_v6, %v3088_v60 }
 0x72d   : > { %v1784_v8 = vmul.f32 %v3094_v7, %v3090_v61 }
 0x72f   : > { %2852 = vmatprep.mubr.msk.f32.mxu0 %vm1151_vm5, %v1784_v8  ;;  %v3059_v8 = vld [vmem:[%s3395_s19] sm:$0xff]  }
 0x730   : > { %2853 = vmatmul.mubr.msk.f32.vlgmr.msra.gmra.mrb[4].mxu0 %vm1151_vm5, %v1785_v9  ;;  %v3060_v9 = vld [vmem:[%s3395_s19 + $0x8] sm:$0xff]  }
 0x731   : > { %2859 = vmatprep.mubr.msk.bf16.mxu0 %vm3195_vm1, %v3194_v31  ;;  %2856 = vmatpush3.bf16.msra.mxu0 %v3055_v43  ;;  %v3061_v43 = vld [vmem:[%s3395_s19 + $0x10] sm:$0xff]  }
 0x732   : > { %2857 = vmatprep.subr.bf16.mxu0 %v3194_v31 }
 0x735   : > { %2858 = vmatpush3.bf16.msra.mxu0 %v3056_v10  ;;  %v3062_v10 = vld [vmem:[%s3395_s19 + $0x18] sm:$0xff]   ;;  %s3785_s19 = sld [smem:[#allocation23_spill]] (!%p2721_p6) }
 0x736   : > { %2871 = vmatprep.subr.bf16.mxu0 %v3194_v31 }
 0x803   : > { %v2854_v11 = vpop.f32.mrb[4].mxu0 }
 0x804   : > { %v1864_v12 = vpop.f32.mrb[5].mxu0 }
 0x805   : > { %v3048_v41 = vpack.i.bf16 %v2854_v11, %v1864_v12 }
 0x807   : > { %3049 = vrot.lane.b32.xlu0 %v3048_v41, %s3209_s28  ;;  %s3781_s28 = scalar_lea.vmem %s3728_s11, %s3353_s0  ;;  %s3782_s0 = sld [smem:[#allocation20_spill]] (!%p2721_p6) }
 0x808   : > { %v2709_v11 = vld [vmem:[%s3781_s28] ss:$0 sm:$0xff] }
 0x879   : > { %v3050_v18 = vpop.permute.xlu0 %3049 }
 0x87a   : > { %v3052_v21 = vunpack.i.h.bf16 %v3050_v18  ;;  %v3051_v22 = vunpack.i.l.bf16 %v3050_v18 }
 0x87c   : > { %v1902_v25 = vsel %vm1901_vm6, %v1899_v23, %v3051_v22  ;;  %v1903_v26 = vsel %vm1901_vm6, %v1900_v24, %v3052_v21 }
 0x87d   : > { %v1908_v27 = vpack.c.bf16 %v1903_v26, %v1902_v25 }
 0x87f   : > { %2860 = vmatmul.mubr.msk.bf16.vlgmr.msra.gmra.mrb[8].mxu0 %vm1010_vm2, %v1908_v27 }
 0x880   : > { %2879 = vmatprep.mubr.msk.bf16.mxu0 %vm3195_vm1, %v3194_v31  ;;  %2872 = vmatpush3.bf16.msra.mxu0 %v3059_v8 }
 0x881   : > { %2873 = vmatprep.subr.bf16.mxu0 %v3194_v31 }
 0x884   : > { %2874 = vmatpush3.bf16.msra.mxu0 %v3060_v9 }
 0x885   : > { %2875 = vmatprep.subr.bf16.mxu0 %v3194_v31 }
 0x888   : > { %2876 = vmatpush3.bf16.msra.mxu0 %v3061_v43 }
 0x889   : > { %2877 = vmatprep.subr.bf16.mxu0 %v3194_v31 }
 0x88c   : > { %2878 = vmatpush3.bf16.msra.mxu0 %v3062_v10  ;;  %v3107_v10 = vld [vmem:[%s3782_s0] sm:$0xff] (!%p2721_p6)  }
 0x952   : > { %v1965_v29 = vpop.f32.mrb[8].mxu0 }
 0x953   : > { %v1966_v30 = vadd.f32 %v2703_v28, %v1965_v29  ;;  %v2861_v32 = vpop.f32.mrb[9].mxu0 }
 0x954   : > { %v1968_v35 = vpop.f32.mrb[10].mxu0 }
 0x955   : > { %v1969_v36 = vadd.f32 %v2703_v28, %v1968_v35  ;;  %v2862_v37 = vpop.f32.mrb[11].mxu0  ;;  %v1972_v39 = vadd.f32 %v1966_v30, %v3440_v33 }
 0x956   : > { %v2713_v37 = vld [vmem:[%s911_s1] ss:$0 sm:$0xff] }
 0x957   : > { %v1976_v40 = vsel %vm1010_vm2, %v1972_v39, 0.0  ;;  %v1973_v42 = vadd.f32 %v1969_v36, %v3442_v34  ;;  %v3057_v34 = vld [vmem:[%s3385_s2] sm:$0xff]   ;;  %s3783_s2 = sld [smem:[#allocation22_spill]] (!%p2721_p6) }
 0x958   : > { %1977 = vadd.xlane.f32.xlu1 %v1976_v40  ;;  %2864 = vmatpush3.bf16.msra.mxu1 %v3057_v34 }
 0x959   : > { %v1979_v49 = vsel %vm1010_vm2, %v1973_v42, 0.0  ;;  %2865 = vmatprep.subr.bf16.mxu1 %v3194_v31 }
 0x95a   : > { %1980 = vadd.xlane.f32.xlu0 %v1979_v49 }
 0x95c   : > { %2866 = vmatpush3.bf16.msra.mxu1 %v3058_v54 }
 0x9e5   : > { %v1978_v44 = vpop.xlane.xlu1 %1977 }
 0x9e6   : > { %v1983_v45 = vmul.f32 0.03125, %v1978_v44 }
 0x9e7   : > { %v1981_v46 = vpop.xlane.xlu0 %1980 }
 0x9e8   : > { %v1985_v47 = vsub.f32 %v1972_v39, %v1983_v45  ;;  %v1984_v48 = vmul.f32 0.03125, %v1981_v46 }
 0x9ea   : > { %v1986_v50 = vsub.f32 %v1973_v42, %v1984_v48  ;;  %v1987_v51 = vmul.f32 %v1985_v47, %v1985_v47 }
 0x9ec   : > { %v1989_v52 = vsel %vm1010_vm2, %v1987_v51, 0.0  ;;  %v1988_v33 = vmul.f32 %v1986_v50, %v1986_v50 }
 0x9ed   : > { %1990 = vadd.xlane.f32.xlu0 %v1989_v52 }
 0x9ee   : > { %v1992_v53 = vsel %vm1010_vm2, %v1988_v33, 0.0 }
 0x9ef   : > { %1993 = vadd.xlane.f32.xlu1 %v1992_v53 }
 0xa7a   : > { %v1991_v55 = vpop.xlane.xlu0 %1990 }
 0xa7b   : > { %v1995_v56 = vmul.f32 0.03125, %v1991_v55 }
 0xa7c   : > { %v1994_v57 = vpop.xlane.xlu1 %1993 }
 0xa7d   : > { %v1997_v58 = vadd.f32 1e-12, %v1995_v56  ;;  %v1996_v59 = vmul.f32 0.03125, %v1994_v57 }
 0xa7f   : > { %3095 = vrsqrt.f32 %v1997_v58  ;;  %v1998_v60 = vadd.f32 1e-12, %v1996_v59 }
 0xa81   : > { %3097 = vrsqrt.f32 %v1998_v60 }
 0xa89   : > { %v3096_v61 = vpop.eup %3095 }
 0xa8a   : > { %v2001_v1 = vmul.f32 %v3096_v61, %v1985_v47 }
 0xa8b   : > { %v3098_v63 = vpop.eup %3097 }
 0xa8c   : > { %v2009_v0 = vmul.f32 %v2707_v62, %v2001_v1  ;;  %v2002_v2 = vmul.f32 %v3098_v63, %v1986_v50 }
 0xa8e   : > { %v2010_v4 = vmul.f32 %v2707_v62, %v2002_v2  ;;  %v2017_v5 = vadd.f32 %v2708_v3, %v2009_v0  ;;  %v2719_v2 = vld [vmem:[%s914_s25] ss:$0 sm:$0xff] }
 0xa90   : > { %v2018_v6 = vadd.f32 %v2708_v3, %v2010_v4 }
 0xa92   : > { %v2023_v7 = vpack.c.bf16 %v2018_v6, %v2017_v5 }
 0xa94   : > { %2868 = vmatmul.mubr.msk.bf16.vlgmr.msra.gmra.mrb[16].mxu1 %vm1010_vm2, %v2023_v7 }
 0xb67   : > { %v2080_v12 = vpop.f32.mrb[16].mxu1 }
 0xb68   : > { %v2081_v41 = vadd.f32 %v2709_v11, %v2080_v12  ;;  %v2869_v13 = vpop.f32.mrb[17].mxu1  ;;  %v3108_v12 = vld [vmem:[%s3782_s0 + $0x8] sm:$0xff] (!%p2721_p6)  }
 0xb69   : > { %v2083_v14 = vpop.f32.mrb[18].mxu1 }
 0xb6a   : > { %v2087_v15 = vmul.f32 %v2081_v41, %v2081_v41  ;;  %v2084_v16 = vadd.f32 %v2709_v11, %v2083_v14  ;;  %v2870_v38 = vpop.f32.mrb[19].mxu1  ;;  %v3210_v11 = vmov (!%p2721_p6), 0.0  }
 0xb6b   : > { %2883 = vmatprep.subr.bf16.mxu0 (!%p2721_p6), %v3210_v11  ;;  %2891 = vmatprep.subr.bf16.mxu1 (!%p2721_p6), %v3210_v11 }
 0xb6c   : > { %v2089_v17 = vmul.f32 %v2087_v15, %v2081_v41  ;;  %v2088_v18 = vmul.f32 %v2084_v16, %v2084_v16  ;;  %2893 = vmatprep.mubr.msk.bf16.mxu1 (!%p2721_p6), %vm3211_vm8, %v3210_v11  ;;  %v3109_v15 = vld [vmem:[%s3783_s2] sm:$0xff] (!%p2721_p6)  }
 0xb6d   : > { %2892 = vmatpush3.bf16.msra.mxu1 (!%p2721_p6), %v3109_v15 }
 0xb6e   : > { %v2091_v19 = vmul.f32 0.044715, %v2089_v17  ;;  %v2090_v20 = vmul.f32 %v2088_v18, %v2084_v16 }
 0xb70   : > { %v2093_v21 = vadd.f32 %v2091_v19, %v2081_v41  ;;  %v2092_v31 = vmul.f32 0.044715, %v2090_v20 }
 0xb72   : > { %v2095_v22 = vmul.f32 0.7978846, %v2093_v21  ;;  %v2094_v23 = vadd.f32 %v2092_v31, %v2084_v16  ;;  %v2726_v31 = vld [vmem:[%s3785_s19] ss:$0 sm:$0xff] (!%p2721_p6) }
 0xb74   : > { %3099 = vtanh.f32 %v2095_v22  ;;  %v2096_v24 = vmul.f32 0.7978846, %v2094_v23 }
 0xb76   : > { %3101 = vtanh.f32 %v2096_v24 }
 0xb7e   : > { %v3100_v25 = vpop.eup %3099 }
 0xb7f   : > { %v2099_v26 = vadd.f32 1.0, %v3100_v25 }
 0xb80   : > { %v3102_v27 = vpop.eup %3101 }
 0xb81   : > { %v2101_v28 = vmul.f32 0.5, %v2099_v26  ;;  %v2100_v29 = vadd.f32 1.0, %v3102_v27 }
 0xb83   : > { %v2102_v30 = vmul.f32 0.5, %v2100_v29  ;;  %v2103_v32 = vmul.f32 %v2101_v28, %v2081_v41 }
 0xb85   : > { %v2104_v35 = vmul.f32 %v2102_v30, %v2084_v16  ;;  %v2722_v16 = vld [vmem:[%s3784_s26] ss:$0 sm:$0xff] (!%p2721_p6) }
 0xb87   : > { %v2113_v36 = vpack.c.bf16 %v2104_v35, %v2103_v32 }
 0xb89   : > { %2880 = vmatmul.mubr.msk.bf16.vlgmr.msra.gmra.mrb[12].mxu0 %vm2145_vm7, %v2113_v36 }
 0xb8a   : > { %2884 = vmatpush3.bf16.msra.mxu0 (!%p2721_p6), %v3107_v10  ;;  %2887 = vmatprep.mubr.msk.bf16.mxu0 (!%p2721_p6), %vm3211_vm8, %v3210_v11 }
 0xb8b   : > { %2885 = vmatprep.subr.bf16.mxu0 (!%p2721_p6), %v3210_v11 }
 0xb8e   : > { %2886 = vmatpush3.bf16.msra.mxu0 (!%p2721_p6), %v3108_v12 }
 0xc5c   : > { %v2183_v39 = vpop.f32.mrb[12].mxu0 }
 0xc5d   : > { %v2184_v40 = vadd.f32 %v2713_v37, %v2183_v39  ;;  %v2881_v42 = vpop.f32.mrb[13].mxu0 }
 0xc5e   : > { %v2186_v49 = vpop.f32.mrb[14].mxu0 }
 0xc5f   : > { %v2187_v44 = vadd.f32 %v2713_v37, %v2186_v49  ;;  %v2882_v45 = vpop.f32.mrb[15].mxu0  ;;  %v2190_v46 = vadd.f32 %v2184_v40, %v2017_v5  ;;  %v2720_v5 = vld [vmem:[%s917_s10] ss:$0 sm:$0xff] }
 0xc61   : > { %v2194_v47 = vsel %vm1010_vm2, %v2190_v46, 0.0  ;;  %v2191_v48 = vadd.f32 %v2187_v44, %v2018_v6 }
 0xc62   : > { %2195 = vadd.xlane.f32.xlu0 %v2194_v47 }
 0xc63   : > { %v2197_v50 = vsel %vm1010_vm2, %v2191_v48, 0.0 }
 0xc64   : > { %2198 = vadd.xlane.f32.xlu1 %v2197_v50 }
 0xcef   : > { %v2196_v51 = vpop.xlane.xlu0 %2195 }
 0xcf0   : > { %v2200_v52 = vmul.f32 0.03125, %v2196_v51 }
 0xcf1   : > { %v2199_v33 = vpop.xlane.xlu1 %2198 }
 0xcf2   : > { %v2202_v53 = vsub.f32 %v2190_v46, %v2200_v52  ;;  %v2201_v34 = vmul.f32 0.03125, %v2199_v33 }
 0xcf4   : > { %v2203_v54 = vsub.f32 %v2191_v48, %v2201_v34  ;;  %v2204_v55 = vmul.f32 %v2202_v53, %v2202_v53 }
 0xcf6   : > { %v2206_v56 = vsel %vm1010_vm2, %v2204_v55, 0.0  ;;  %v2205_v57 = vmul.f32 %v2203_v54, %v2203_v54 }
 0xcf7   : > { %2207 = vadd.xlane.f32.xlu0 %v2206_v56 }
 0xcf8   : > { %v2209_v58 = vsel %vm1010_vm2, %v2205_v57, 0.0 }
 0xcf9   : > { %2210 = vadd.xlane.f32.xlu1 %v2209_v58 }
 0xd84   : > { %v2208_v59 = vpop.xlane.xlu0 %2207 }
 0xd85   : > { %v2212_v60 = vmul.f32 0.03125, %v2208_v59 }
 0xd86   : > { %v2211_v61 = vpop.xlane.xlu1 %2210 }
 0xd87   : > { %v2214_v62 = vadd.f32 1e-12, %v2212_v60  ;;  %v2213_v1 = vmul.f32 0.03125, %v2211_v61 }
 0xd89   : > { %3103 = vrsqrt.f32 %v2214_v62  ;;  %v2215_v63 = vadd.f32 1e-12, %v2213_v1 }
 0xd8b   : > { %3105 = vrsqrt.f32 %v2215_v63 }
 0xd93   : > { %v3104_v0 = vpop.eup %3103 }
 0xd94   : > { %v2218_v3 = vmul.f32 %v3104_v0, %v2202_v53 }
 0xd95   : > { %v3106_v4 = vpop.eup %3105 }
 0xd96   : > { %v2226_v6 = vmul.f32 %v2719_v2, %v2218_v3  ;;  %v2219_v7 = vmul.f32 %v3106_v4, %v2203_v54  ;;  %2243 = sbr.rel (%p2721_p6) target bundleno = 3920 (0xf50), region = 108 }
 0xd98   : > { %v2234_v8 = vadd.f32 %v2720_v5, %v2226_v6  ;;  %v2227_v9 = vmul.f32 %v2719_v2, %v2219_v7 }
 0xd9a   : > { %2236 = vst.msk [vmem:[#allocation2] sm:$0xff] %vm1010_vm2, %v2234_v8  ;;  %2238 = vst.msk [vmem:[%s3412_s4] sm:$0xff] %vm1010_vm2, %v2234_v8  ;;  %v2235_v43 = vadd.f32 %v2720_v5, %v2227_v9 }
 0xd9c   : > { %2237 = vst.msk [vmem:[#allocation2 + $0x8] sm:$0xff] %vm1010_vm2, %v2235_v43  ;;  %2239 = vst.msk [vmem:[%s3412_s4 + $0x8] sm:$0xff] %vm1010_vm2, %v2235_v43  ;;  %v2245_v41 = vrot.slane (!%p2721_p6), %v2235_v43, 7 }
 0xd9e   : > { %v2248_v13 = vsel %vm2247_vm9, %v2234_v8, %v2245_v41 }
 0xd9f   : > { %v2253_v14 = vpack.c.bf16 %v2248_v13, %v2248_v13 }
 0xda1   : > { %2888 = vmatmul.mubr.msk.bf16.vlgmr.msra.gmra.mrb[0].mxu0 %vm1010_vm2, %v2253_v14 }
 0xe74   : > { %v2310_v38 = vpop.f32.mrb[0].mxu0 }
 0xe75   : > { %v2311_v17 = vadd.f32 %v2722_v16, %v2310_v38  ;;  %v2889_v18 = vpop.f32.mrb[1].mxu0 }
 0xe76   : > { %v2313_v19 = vpop.f32.mrb[2].mxu0 }
 0xe77   : > { %v2318_v20 = vpack.c.bf16 %v2311_v17, %v2311_v17  ;;  %v2890_v21 = vpop.f32.mrb[3].mxu0 }
 0xe79   : > { %2894 = vmatmul.mubr.msk.bf16.vlgmr.msra.gmra.mrb[0].mxu1 %vm1151_vm5, %v2318_v20 }
 0xf4c   : > { %v2369_v22 = vpop.f32.mrb[0].mxu1 }
 0xf4d   : > { %v2370_v23 = vadd.f32 %v2726_v31, %v2369_v22  ;;  %v2895_v24 = vpop.f32.mrb[1].mxu1 }
 0xf4e   : > { %v2372_v25 = vpop.f32.mrb[2].mxu1 }
 0xf4f   : > { %2375 = vst [vmem:[#allocation5] sm:$0x3] %v2370_v23  ;;  %v2896_v26 = vpop.f32.mrb[3].mxu1 }
 0xf50 PF: > { %s3786_s22 = sld [smem:[#allocation10_spill]]  ;;  %s3212_s27 = smov [#allocation3]  }
 0xf51   : > { %s2394_s29 = sshll.u32 %s3212_s27, 4  ;;  %s3213_s25 = smov [#allocation5]   ;;  %s2395_s29 = int_to_ptr.vmem [resolvable:$true] %s2394_s29 }
 0xf52   : > { %s2413_s18 = sshll.u32 %s3213_s25, 4  ;;  %s3110_s10 = scalar_lea.vmem %s2395_s29, 256  ;;  %s2414_s18 = int_to_ptr.vmem [resolvable:$true] %s2413_s18 }
 0xf53   : > { %p3111_p8 = scmp.ne.s32.totalorder %s2395_s29, %s3110_s10  ;;  %p3117_p11 = scmp.lt.s32.totalorder %s2395_s29, %s2395_s29 }
 0xf54   : > { %p3118_p12 = scmp.lt.s32.totalorder %s3110_s10, %s3110_s10 }
 0xf56   : > { %s3787_s1 = sadd.s32 4294967295, %s3786_s22   ;;  %p3119_p13 = por %p3118_p12, %p3117_p11 }
 0xf57   : > { %p3659_p7 = scmp.eq.s32.totalorder %s3787_s1, 1 }
 0xf59   : > { %p3112_p9 = pnand %p3111_p8, %p3659_p7 }
 0xf5b   : > { %p3113_p10 = pneg %p3112_p9 }
 0xf5d   : > { %p3120_p0 = pnand %p3119_p13, %p3113_p10 }
 0xf5f   : > { %3123 = shalt.err (!%p3120_p0)
}
 0xf60   : > { %s3789_s4 = sld [smem:[#allocation24_spill]] }
 0xf66   : > { %s3124_s2 = scalar_lea.hbm %s3789_s4, 256 }
 0xf67   : > { %p3125_p1 = scmp.ne.s32.totalorder %s3789_s4, %s3124_s2  ;;  %p3130_p4 = scmp.lt.u32.totalorder %s3124_s2, %s3789_s4 }
 0xf69   : > { %p3126_p2 = pnand %p3125_p1, %p3659_p7 }
 0xf6b   : > { %p3127_p3 = pneg %p3126_p2 }
 0xf6d   : > { %p3132_p5 = pnand %p3130_p4, %p3127_p3 }
 0xf6f   : > { %3135 = shalt.err (!%p3132_p5)
}
 0xf70   : > { %s3214_s28 = smov 128   ;;  %s3136_s1 = scalar_lea.vmem %s2414_s18, 32 }
 0xf71   : > { %2938 = dma.vmem_to_hbm [thread:$0]  (%p3659_p7), %s2395_s29, 256, %s3789_s4, [#allocation4], %s3214_s28, %s3214_s28, %s3206_s5  }
 0xf72   : > { %p3137_p6 = scmp.ne.s32.totalorder %s2414_s18, %s3136_s1  ;;  %p3143_p10 = scmp.lt.s32.totalorder %s2414_s18, %s2414_s18 }
 0xf73   : > { %p3144_p11 = scmp.lt.s32.totalorder %s3136_s1, %s3136_s1 }
 0xf74   : > { %p3138_p8 = pnand %p3137_p6, %p3659_p7 }
 0xf75   : > { %p3145_p12 = por %p3144_p11, %p3143_p10 }
 0xf76   : > { %p3139_p9 = pneg %p3138_p8 }
 0xf78   : > { %p3146_p13 = pnand %p3145_p12, %p3139_p9 }
 0xf7a   : > { %3149 = shalt.err (!%p3146_p13)
}
 0xf7b   : > { %s3790_s10 = sld [smem:[#allocation25_spill]] }
 0xf81   : > { %s3150_s24 = scalar_lea.hbm %s3790_s10, 32 }
 0xf82   : > { %p3151_p0 = scmp.ne.s32.totalorder %s3790_s10, %s3150_s24  ;;  %p3156_p3 = scmp.lt.u32.totalorder %s3150_s24, %s3790_s10 }
 0xf84   : > { %p3152_p1 = pnand %p3151_p0, %p3659_p7 }
 0xf86   : > { %p3153_p2 = pneg %p3152_p1 }
 0xf88   : > { %p3158_p4 = pnand %p3156_p3, %p3153_p2 }
 0xf8a   : > { %3161 = shalt.err (!%p3158_p4)
}
 0xf8b   : > { %2940 = dma.vmem_to_hbm [thread:$0]  (%p3659_p7), %s2414_s18, 32, %s3790_s10, [#allocation6]  }
 0xf8c   : > { %3175 = dma.done.wait (%p3659_p7), [#allocation4], 256  }
 0xf8d   : > { %3177 = vsyncadd (%p3659_p7), [#allocation4], 4294967040 }
 0xf8e   : > { %3179 = dma.done.wait (%p3659_p7), [#allocation6], 32  }
 0xf8f   : > { %3181 = vsyncadd (%p3659_p7), [#allocation6], 4294967264 }
 0xf90 PF: > { %s3791_s26 = sld [smem:[#allocation10_spill]]  ;;  %s3792_s3 = sld [smem:[#allocation9_spill]] }
 0xf91   : > { %s3793_s28 = sld [smem:[#allocation11_spill]] }
 0xf96   : > { %s35_s29 = sadd.s32 1, %s3791_s26  }
 0xf97   : > { %p32_p5 = scmp.ge.s32.totalorder %s35_s29, 4  }
 0xf99   :  { %34 = sbr.rel (!%p32_p5) target bundleno = 18 (0x12), region = 196 }
 0xfa0   :  { %2442 = vsyncpa [#allocation4], 1 }
 0xfa1   :  { %2444 = vsyncpa [#allocation4 + $0x1], 1 }
 0xfa2   :  { %2445 = vsyncpa [#allocation6], 1 }

</bundles_post_ra>
